<compile_context>
chip_gen: v6e
topology: v6e:2x2x1
jax: 0.10.0
libtpu: 0.0.40
codegen_flags: <defaults>
</compile_context>

<pallas_src>
import functools
import math

import jax
import jax.numpy as jnp
from jax import lax
from jax.experimental import pallas as pl
from jax.experimental.pallas import tpu as pltpu


# ----------------------------- Pallas kernel ------------------------------- #
def _gat_layer_kernel(num_heads, d_out, apply_elu,
                      tile_mask_ref,                       # scalar-prefetch (SMEM)
                      xq_ref, xk_ref, adj_ref,             # tiled inputs
                      w_ref, asrc_ref, adst_ref,           # per-layer params
                      out_ref,                             # (tj, D) output tile
                      acc_ref):                            # VMEM (H, tj, D+1)
    j = pl.program_id(0)
    k = pl.program_id(1)

    @pl.when(k == 0)
    def _init():
        acc_ref[...] = jnp.zeros_like(acc_ref)

    # Skip entire score/exp/matmul body for all-zero adjacency tiles.
    @pl.when(tile_mask_ref[j, k] != 0)
    def _compute():
        xq = xq_ref[...].astype(jnp.float32)               # (tj, D)   queries
        xk = xk_ref[...].astype(jnp.float32)               # (tk, D)   keys/values
        adj = adj_ref[...].astype(jnp.float32)             # (tj, tk)  {0,1} mask
        w = w_ref[...]                                     # (H, D)

        # Negated combined logit vectors:  a·(x*w) == (a*w)·x
        asw_neg = -(asrc_ref[...] * w)                     # (H, D)
        adw_neg = -(adst_ref[...] * w)                     # (H, D)

        # Negated destination logits for ALL heads in one small MXU matmul:
        #   neg_f_dst[h, c] = -sum_d (a_dst*w)[h, d] * xk[c, d]   -> (H, tk)
        neg_f_dst = lax.dot_general(
            adw_neg, xk, (((1,), (1,)), ((), ())),
            preferred_element_type=jnp.float32)

        # Values with a fused ones column: e @ [h | 1] = [agg | rowsum].
        ones_k = jnp.ones((xk.shape[0], 1), jnp.float32)
        ones_h = jnp.ones((num_heads, 1), jnp.float32)
        xk_cat = jnp.concatenate([xk, ones_k], axis=-1)    # (tk, D+1)
        w_cat = jnp.concatenate([w, ones_h], axis=-1)      # (H, D+1)

        # NOTE: static Python unroll keeps one (tj,tk) chain live per head; fine
        # for small head counts — switch to lax.fori_loop(unroll=True) if H > 2.
        for hd in range(num_heads):
            # Negated source logits: VPU multiply + lane reduce -> (tj, 1) column.
            neg_f_src = jnp.sum(xq * asw_neg[hd:hd + 1, :], axis=-1, keepdims=True)

            # t = -(f_src + f_dst); exp(-leaky_relu(s, 0.2)) == exp(min(t, 0.2*t))
            t = neg_f_src + neg_f_dst[hd:hd + 1, :]        # (tj, tk)
            e = jnp.exp(jnp.minimum(t, 0.2 * t)) * adj     # (tj, tk) f32

            h_cat = (xk_cat * w_cat[hd:hd + 1, :]).astype(jnp.bfloat16)  # (tk, D+1)

            # bf16 MXU operands, f32 accumulate; last column is the rowsum.
            acc_ref[hd] += jnp.dot(e.astype(jnp.bfloat16), h_cat,
                                   preferred_element_type=jnp.float32)

    @pl.when(k == pl.num_programs(1) - 1)
    def _finalize():
        acc = acc_ref[...]                                 # (H, tj, D+1)
        num = acc[:, :, :d_out]
        den = acc[:, :, d_out:d_out + 1]
        # NOTE: isolated nodes (rowsum == 0) would give inf/NaN, matching the
        # reference semantics; the wrapper guarantees self-loops for padding.
        per_head = num * pl.reciprocal(den, approx=True)
        o = jnp.sum(per_head, axis=0) * (1.0 / num_heads)  # mean over heads
        if apply_elu:                                      # fused inter-layer ELU
            o = jnp.where(o > 0, o, jnp.exp(jnp.minimum(o, 0.0)) - 1.0)
        out_ref[...] = o.astype(out_ref.dtype)


# ------------------------------ GAT forward -------------------------------- #
def gat_forward(x, adj, params, *, tile=128):
    """diag=True, instance_normalization=False, eval mode (dropout = identity).

    x: (N, D) float32; adj: (N, N) float32 {0,1}; params: list of
    (w, a_src, a_dst), each (n_head, D).  Returns (N, D).
    """
    N, D = x.shape
    num_layer = len(params)

    # Pad node count to a lane-friendly multiple of the tile size.
    Np = ((N + tile - 1) // tile) * tile
    if Np != N:
        x = jnp.pad(x, ((0, Np - N), (0, 0)))
        adj = jnp.pad(adj, ((0, Np - N), (0, Np - N)))
        pad_idx = jnp.arange(N, Np)
        adj = adj.at[pad_idx, pad_idx].set(1.0)            # self-loops for padding

    nj = Np // tile
    nk = Np // tile

    # Block-sparsity map: 1 iff the (tj, tk) adjacency tile has any edge.
    tile_mask = (adj.reshape(nj, tile, nk, tile).sum(axis=(1, 3)) > 0).astype(jnp.int32)

    # adj is the only O(N^2) HBM operand: ship it as bf16 ({0,1} exact).
    adj_bf16 = adj.astype(jnp.bfloat16)

    for li, (w, a_src, a_dst) in enumerate(params):
        n_head, d_out = w.shape
        assert d_out == x.shape[1], "diag=True requires f_in == f_out"
        apply_elu = (li + 1 < num_layer)

        grid_spec = pltpu.PrefetchScalarGridSpec(
            num_scalar_prefetch=1,                          # tile_mask -> SMEM
            grid=(nj, nk),
            in_specs=[
                pl.BlockSpec((tile, d_out), lambda j, k, m: (j, 0)),     # x (queries)
                pl.BlockSpec((tile, d_out), lambda j, k, m: (k, 0)),     # x (keys/vals)
                pl.BlockSpec((tile, tile), lambda j, k, m: (j, k)),      # adj tile
                pl.BlockSpec((n_head, d_out), lambda j, k, m: (0, 0)),   # w
                pl.BlockSpec((n_head, d_out), lambda j, k, m: (0, 0)),   # a_src
                pl.BlockSpec((n_head, d_out), lambda j, k, m: (0, 0)),   # a_dst
            ],
            out_specs=pl.BlockSpec((tile, d_out), lambda j, k, m: (j, 0)),
            scratch_shapes=[pltpu.VMEM((n_head, tile, d_out + 1), jnp.float32)],
        )

        x = pl.pallas_call(
            functools.partial(_gat_layer_kernel, n_head, d_out, apply_elu),
            out_shape=jax.ShapeDtypeStruct((Np, d_out), jnp.float32),
            grid_spec=grid_spec,
            compiler_params=pltpu.CompilerParams(
                dimension_semantics=("parallel", "arbitrary"),
                vmem_limit_bytes=48 * 1024 * 1024,
            ),
        )(tile_mask, x, x, adj_bf16, w, a_src, a_dst)

    return x[:N]


# -------------------------- pure-JAX reference ------------------------------ #
def gat_layer_ref(x, w, a_src, a_dst, adj):
    outs = []
    for i in range(w.shape[0]):
        h = x * w[i]
        f_src = h @ a_src[i]
        f_dst = h @ a_dst[i]
        scores = f_src[:, None] + f_dst[None, :]
        lrelu = jnp.where(scores > 0, scores, 0.2 * scores)
        e = jnp.exp(-lrelu) * adj
        rowsum = e.sum(-1, keepdims=True)
        outs.append((e @ h) / rowsum)
    return jnp.stack(outs)


def gat_forward_ref(x, adj, params):
    num_layer = len(params)
    for i, (w, a_src, a_dst) in enumerate(params):
        x = gat_layer_ref(x, w, a_src, a_dst, adj).mean(axis=0)
        if i + 1 < num_layer:
            x = jax.nn.elu(x)
    return x


# --------------------------------- main ------------------------------------ #
if __name__ == "__main__":
    # GAT(n_units=[32,32,32], n_heads=[2,2], dropout=0.0, attn_dropout=0.0,
    #     instance_normalization=False, diag=True)
    n_units = [32, 32, 32]
    n_heads = [2, 2]
    N = 200  # number of graph nodes (exercises the pad-to-128 path)

    key = jax.random.PRNGKey(0)
    k_x, k_adj, k_a = jax.random.split(key, 3)

    # node features
    x = jax.random.normal(k_x, (N, n_units[0]), dtype=jnp.float32)

    # deterministic sparse-ish adjacency with self loops
    adj = jax.random.bernoulli(k_adj, p=0.15, shape=(N, N)).astype(jnp.float32)
    adj = jnp.minimum(adj + jnp.eye(N, dtype=jnp.float32), 1.0)

    # per-layer parameters (diag=True: w = ones_, a ~ U(-stdv, stdv), stdv=1/sqrt(2*f_out))
    params = []
    for li in range(len(n_units) - 1):
        f_out = n_units[li + 1]
        n_head = n_heads[li]
        k_a, sub = jax.random.split(k_a)
        w = jnp.ones((n_head, f_out), dtype=jnp.float32)              # nn.init.ones_
        stdv = 1.0 / math.sqrt(2 * f_out)
        a = jax.random.uniform(sub, (n_head, 2 * f_out), jnp.float32,
                               minval=-stdv, maxval=stdv)
        a_src = a[:, :f_out]                                          # (n_head, f_out)
        a_dst = a[:, f_out:]                                          # (n_head, f_out)
        params.append((w, a_src, a_dst))

    out = gat_forward(x, adj, params)
    out = jax.block_until_ready(out)

    ref = gat_forward_ref(x, adj, params)
    assert out.shape == (N, n_units[-1])
    # bf16 MXU operands + approx reciprocal -> relaxed tolerance vs f32 reference.
    assert jnp.allclose(out, ref, atol=2e-2, rtol=2e-2), "mismatch vs JAX reference"

    print("KERNEL_OK")
</pallas_src>

<mosaic_0001>
module attributes {stable_mosaic.version = 11 : i64} {
  func.func @_gat_layer_kernel(%arg0: i32, %arg1: i32, %arg2: memref<2x2xi32, #tpu.memory_space<smem>>, %arg3: memref<128x32xf32, #tpu.memory_space<vmem>>, %arg4: memref<128x32xf32, #tpu.memory_space<vmem>>, %arg5: memref<128x128xbf16, #tpu.memory_space<vmem>>, %arg6: memref<2x32xf32, #tpu.memory_space<vmem>>, %arg7: memref<2x32xf32, #tpu.memory_space<vmem>>, %arg8: memref<2x32xf32, #tpu.memory_space<vmem>>, %arg9: memref<128x32xf32, #tpu.memory_space<vmem>>, %arg10: memref<2x128x33xf32, #tpu.memory_space<vmem>>) attributes {dimension_semantics = [#tpu.dimension_semantics<parallel>, #tpu.dimension_semantics<arbitrary>], iteration_bounds = array<i64: 2, 2>, scalar_prefetch = 1 : i64, scratch_operands = 1 : i64, tpu.core_type = #tpu.core_type<tc>, window_params = [{transform_indices = @transform_0, window_bounds = array<i64: 128, 32>}, {transform_indices = @transform_1, window_bounds = array<i64: 128, 32>}, {transform_indices = @transform_2, window_bounds = array<i64: 128, 128>}, {pipeline_mode = #tpu.pipeline_mode<synchronous>, transform_indices = @transform_3, window_bounds = array<i64: 2, 32>}, {pipeline_mode = #tpu.pipeline_mode<synchronous>, transform_indices = @transform_4, window_bounds = array<i64: 2, 32>}, {pipeline_mode = #tpu.pipeline_mode<synchronous>, transform_indices = @transform_5, window_bounds = array<i64: 2, 32>}, {transform_indices = @transform_6, window_bounds = array<i64: 128, 32>}]} {
    %c0_i32 = arith.constant 0 : i32
    %0 = arith.cmpi eq, %arg1, %c0_i32 : i32
    %1 = arith.extui %0 : i1 to i32
    %c0_i32_0 = arith.constant 0 : i32
    %2 = arith.cmpi ne, %1, %c0_i32_0 : i32
    scf.if %2 {
      %cst = arith.constant 0.000000e+00 : f32
      %12 = vector.broadcast %cst : f32 to vector<2x128x33xf32>
      %c0 = arith.constant 0 : index
      %c0_4 = arith.constant 0 : index
      %c0_5 = arith.constant 0 : index
      %13 = vector.load %arg10[%c0, %c0_4, %c0_5] : memref<2x128x33xf32, #tpu.memory_space<vmem>>, vector<2x128x33xf32>
      tpu.vector_store %arg10[%c0, %c0_4, %c0_5], %12 {strides = array<i32>} : memref<2x128x33xf32, #tpu.memory_space<vmem>>, vector<2x128x33xf32>,
    } else {
    }
    %3 = arith.index_cast %arg0 : i32 to index
    %4 = arith.index_cast %arg1 : i32 to index
    %5 = memref.load %arg2[%3, %4] : memref<2x2xi32, #tpu.memory_space<smem>>
    %c0_i32_1 = arith.constant 0 : i32
    %6 = arith.cmpi ne, %5, %c0_i32_1 : i32
    %7 = arith.extui %6 : i1 to i32
    %c0_i32_2 = arith.constant 0 : i32
    %8 = arith.cmpi ne, %7, %c0_i32_2 : i32
    scf.if %8 {
      %c0 = arith.constant 0 : index
      %c0_4 = arith.constant 0 : index
      %12 = vector.load %arg3[%c0, %c0_4] : memref<128x32xf32, #tpu.memory_space<vmem>>, vector<128x32xf32>
      %c0_5 = arith.constant 0 : index
      %c0_6 = arith.constant 0 : index
      %13 = vector.load %arg4[%c0_5, %c0_6] : memref<128x32xf32, #tpu.memory_space<vmem>>, vector<128x32xf32>
      %c0_7 = arith.constant 0 : index
      %c0_8 = arith.constant 0 : index
      %14 = vector.load %arg5[%c0_7, %c0_8] : memref<128x128xbf16, #tpu.memory_space<vmem>>, vector<128x128xbf16>
      %15 = arith.extf %14 : vector<128x128xbf16> to vector<128x128xf32>
      %c0_9 = arith.constant 0 : index
      %c0_10 = arith.constant 0 : index
      %16 = vector.load %arg6[%c0_9, %c0_10] : memref<2x32xf32, #tpu.memory_space<vmem>>, vector<2x32xf32>
      %c0_11 = arith.constant 0 : index
      %c0_12 = arith.constant 0 : index
      %17 = vector.load %arg7[%c0_11, %c0_12] : memref<2x32xf32, #tpu.memory_space<vmem>>, vector<2x32xf32>
      %18 = arith.mulf %17, %16 : vector<2x32xf32>
      %cst = arith.constant 0.000000e+00 : f32
      %19 = vector.broadcast %cst : f32 to vector<2x32xf32>
      %20 = arith.subf %19, %18 : vector<2x32xf32>
      %c0_13 = arith.constant 0 : index
      %c0_14 = arith.constant 0 : index
      %21 = vector.load %arg8[%c0_13, %c0_14] : memref<2x32xf32, #tpu.memory_space<vmem>>, vector<2x32xf32>
      %22 = arith.mulf %21, %16 : vector<2x32xf32>
      %cst_15 = arith.constant 0.000000e+00 : f32
      %23 = vector.broadcast %cst_15 : f32 to vector<2x32xf32>
      %24 = arith.subf %23, %22 : vector<2x32xf32>
      %cst_16 = arith.constant dense<0.000000e+00> : vector<2x128xf32>
      %25 = tpu.matmul %24, %13, %cst_16 {dimension_numbers = #tpu.dot_dimension_numbers<[1], [1], [0], [0], [0, 0, 1, 0], [], []>} : vector<2x32xf32>, vector<128x32xf32>, vector<2x128xf32> -> vector<2x128xf32>
      %cst_17 = arith.constant 1.000000e+00 : f32
      %26 = vector.broadcast %cst_17 : f32 to vector<128x1xf32>
      %cst_18 = arith.constant 1.000000e+00 : f32
      %27 = vector.broadcast %cst_18 : f32 to vector<2x1xf32>
      %28 = tpu.concatenate %13, %26 in 1 : vector<128x32xf32>, vector<128x1xf32> -> vector<128x33xf32>
      %29 = tpu.concatenate %16, %27 in 1 : vector<2x32xf32>, vector<2x1xf32> -> vector<2x33xf32>
      %30 = vector.extract_strided_slice %20 {offsets = [0, 0], sizes = [1, 32], strides = [1, 1]} : vector<2x32xf32> to vector<1x32xf32>
      %31 = vector.broadcast %30 : vector<1x32xf32> to vector<128x32xf32>
      %32 = arith.mulf %12, %31 : vector<128x32xf32>
      %cst_19 = arith.constant dense<0.000000e+00> : vector<128xf32>
      %33 = vector.multi_reduction <add>, %32, %cst_19 [1] : vector<128x32xf32> to vector<128xf32>
      %34 = vector.shape_cast %33 : vector<128xf32> to vector<128x1xf32>
      %35 = vector.extract_strided_slice %25 {offsets = [0, 0], sizes = [1, 128], strides = [1, 1]} : vector<2x128xf32> to vector<1x128xf32>
      %36 = vector.broadcast %34 : vector<128x1xf32> to vector<128x128xf32>
      %37 = vector.broadcast %35 : vector<1x128xf32> to vector<128x128xf32>
      %38 = arith.addf %36, %37 : vector<128x128xf32>
      %cst_20 = arith.constant 2.000000e-01 : f32
      %39 = vector.broadcast %cst_20 : f32 to vector<128x128xf32>
      %40 = arith.mulf %39, %38 : vector<128x128xf32>
      %41 = arith.minimumf %38, %40 : vector<128x128xf32>
      %42 = math.exp %41 : vector<128x128xf32>
      %43 = arith.mulf %42, %15 : vector<128x128xf32>
      %44 = vector.extract_strided_slice %29 {offsets = [0, 0], sizes = [1, 33], strides = [1, 1]} : vector<2x33xf32> to vector<1x33xf32>
      %45 = vector.broadcast %44 : vector<1x33xf32> to vector<128x33xf32>
      %46 = arith.mulf %28, %45 : vector<128x33xf32>
      %47 = arith.truncf %46 : vector<128x33xf32> to vector<128x33xbf16>
      %c0_21 = arith.constant 0 : index
      %c0_22 = arith.constant 0 : index
      %c0_23 = arith.constant 0 : index
      %48 = vector.load %arg10[%c0_21, %c0_22, %c0_23] : memref<2x128x33xf32, #tpu.memory_space<vmem>>, vector<1x128x33xf32>
      %49 = vector.shape_cast %48 : vector<1x128x33xf32> to vector<128x33xf32>
      %50 = arith.truncf %43 : vector<128x128xf32> to vector<128x128xbf16>
      %cst_24 = arith.constant dense<0.000000e+00> : vector<128x33xf32>
      %51 = tpu.matmul %50, %47, %cst_24 {dimension_numbers = #tpu.dot_dimension_numbers<[1], [0], [0], [1], [0, 0, 1, 1], [], []>} : vector<128x128xbf16>, vector<128x33xbf16>, vector<128x33xf32> -> vector<128x33xf32>
      %52 = arith.addf %49, %51 : vector<128x33xf32>
      %c0_25 = arith.constant 0 : index
      %c0_26 = arith.constant 0 : index
      %c0_27 = arith.constant 0 : index
      %53 = vector.load %arg10[%c0_25, %c0_26, %c0_27] : memref<2x128x33xf32, #tpu.memory_space<vmem>>, vector<1x128x33xf32>
      %54 = vector.shape_cast %53 : vector<1x128x33xf32> to vector<128x33xf32>
      %55 = vector.shape_cast %52 : vector<128x33xf32> to vector<1x128x33xf32>
      tpu.vector_store %arg10[%c0_25, %c0_26, %c0_27], %55 {strides = array<i32>} : memref<2x128x33xf32, #tpu.memory_space<vmem>>, vector<1x128x33xf32>,
      %56 = vector.extract_strided_slice %20 {offsets = [1, 0], sizes = [1, 32], strides = [1, 1]} : vector<2x32xf32> to vector<1x32xf32>
      %57 = vector.broadcast %56 : vector<1x32xf32> to vector<128x32xf32>
      %58 = arith.mulf %12, %57 : vector<128x32xf32>
      %cst_28 = arith.constant dense<0.000000e+00> : vector<128xf32>
      %59 = vector.multi_reduction <add>, %58, %cst_28 [1] : vector<128x32xf32> to vector<128xf32>
      %60 = vector.shape_cast %59 : vector<128xf32> to vector<128x1xf32>
      %61 = vector.extract_strided_slice %25 {offsets = [1, 0], sizes = [1, 128], strides = [1, 1]} : vector<2x128xf32> to vector<1x128xf32>
      %62 = vector.broadcast %60 : vector<128x1xf32> to vector<128x128xf32>
      %63 = vector.broadcast %61 : vector<1x128xf32> to vector<128x128xf32>
      %64 = arith.addf %62, %63 : vector<128x128xf32>
      %cst_29 = arith.constant 2.000000e-01 : f32
      %65 = vector.broadcast %cst_29 : f32 to vector<128x128xf32>
      %66 = arith.mulf %65, %64 : vector<128x128xf32>
      %67 = arith.minimumf %64, %66 : vector<128x128xf32>
      %68 = math.exp %67 : vector<128x128xf32>
      %69 = arith.mulf %68, %15 : vector<128x128xf32>
      %70 = vector.extract_strided_slice %29 {offsets = [1, 0], sizes = [1, 33], strides = [1, 1]} : vector<2x33xf32> to vector<1x33xf32>
      %71 = vector.broadcast %70 : vector<1x33xf32> to vector<128x33xf32>
      %72 = arith.mulf %28, %71 : vector<128x33xf32>
      %73 = arith.truncf %72 : vector<128x33xf32> to vector<128x33xbf16>
      %c1 = arith.constant 1 : index
      %c0_30 = arith.constant 0 : index
      %c0_31 = arith.constant 0 : index
      %74 = vector.load %arg10[%c1, %c0_30, %c0_31] : memref<2x128x33xf32, #tpu.memory_space<vmem>>, vector<1x128x33xf32>
      %75 = vector.shape_cast %74 : vector<1x128x33xf32> to vector<128x33xf32>
      %76 = arith.truncf %69 : vector<128x128xf32> to vector<128x128xbf16>
      %cst_32 = arith.constant dense<0.000000e+00> : vector<128x33xf32>
      %77 = tpu.matmul %76, %73, %cst_32 {dimension_numbers = #tpu.dot_dimension_numbers<[1], [0], [0], [1], [0, 0, 1, 1], [], []>} : vector<128x128xbf16>, vector<128x33xbf16>, vector<128x33xf32> -> vector<128x33xf32>
      %78 = arith.addf %75, %77 : vector<128x33xf32>
      %c1_33 = arith.constant 1 : index
      %c0_34 = arith.constant 0 : index
      %c0_35 = arith.constant 0 : index
      %79 = vector.load %arg10[%c1_33, %c0_34, %c0_35] : memref<2x128x33xf32, #tpu.memory_space<vmem>>, vector<1x128x33xf32>
      %80 = vector.shape_cast %79 : vector<1x128x33xf32> to vector<128x33xf32>
      %81 = vector.shape_cast %78 : vector<128x33xf32> to vector<1x128x33xf32>
      tpu.vector_store %arg10[%c1_33, %c0_34, %c0_35], %81 {strides = array<i32>} : memref<2x128x33xf32, #tpu.memory_space<vmem>>, vector<1x128x33xf32>,
    } else {
    }
    %c1_i32 = arith.constant 1 : i32
    %9 = arith.cmpi eq, %arg1, %c1_i32 : i32
    %10 = arith.extui %9 : i1 to i32
    %c0_i32_3 = arith.constant 0 : i32
    %11 = arith.cmpi ne, %10, %c0_i32_3 : i32
    scf.if %11 {
      %c0 = arith.constant 0 : index
      %c0_4 = arith.constant 0 : index
      %c0_5 = arith.constant 0 : index
      %12 = vector.load %arg10[%c0, %c0_4, %c0_5] : memref<2x128x33xf32, #tpu.memory_space<vmem>>, vector<2x128x33xf32>
      %13 = vector.extract_strided_slice %12 {offsets = [0, 0, 0], sizes = [2, 128, 32], strides = [1, 1, 1]} : vector<2x128x33xf32> to vector<2x128x32xf32>
      %14 = vector.extract_strided_slice %12 {offsets = [0, 0, 32], sizes = [2, 128, 1], strides = [1, 1, 1]} : vector<2x128x33xf32> to vector<2x128x1xf32>
      %15 = tpu.reciprocal %14 {approx = true} : vector<2x128x1xf32> -> vector<2x128x1xf32>
      %16 = vector.broadcast %15 : vector<2x128x1xf32> to vector<2x128x32xf32>
      %17 = arith.mulf %13, %16 : vector<2x128x32xf32>
      %cst = arith.constant dense<0.000000e+00> : vector<128x32xf32>
      %18 = vector.multi_reduction <add>, %17, %cst [0] : vector<2x128x32xf32> to vector<128x32xf32>
      %cst_6 = arith.constant 5.000000e-01 : f32
      %19 = vector.broadcast %cst_6 : f32 to vector<128x32xf32>
      %20 = arith.mulf %18, %19 : vector<128x32xf32>
      %cst_7 = arith.constant 0.000000e+00 : f32
      %21 = vector.broadcast %cst_7 : f32 to vector<128x32xf32>
      %22 = arith.cmpf ogt, %20, %21 : vector<128x32xf32>
      %cst_8 = arith.constant 0.000000e+00 : f32
      %23 = vector.broadcast %cst_8 : f32 to vector<128x32xf32>
      %24 = arith.minimumf %20, %23 : vector<128x32xf32>
      %25 = math.exp %24 : vector<128x32xf32>
      %cst_9 = arith.constant 1.000000e+00 : f32
      %26 = vector.broadcast %cst_9 : f32 to vector<128x32xf32>
      %27 = arith.subf %25, %26 : vector<128x32xf32>
      %28 = arith.select %22, %20, %27 : vector<128x32xi1>, vector<128x32xf32>
      %c0_10 = arith.constant 0 : index
      %c0_11 = arith.constant 0 : index
      %29 = vector.load %arg9[%c0_10, %c0_11] : memref<128x32xf32, #tpu.memory_space<vmem>>, vector<128x32xf32>
      tpu.vector_store %arg9[%c0_10, %c0_11], %28 {strides = array<i32>} : memref<128x32xf32, #tpu.memory_space<vmem>>, vector<128x32xf32>,
    } else {
    }
    return
  }
  func.func @transform_0(%arg0: i32, %arg1: i32, %arg2: memref<2x2xi32, #tpu.memory_space<smem>>) -> (i32, i32) {
    %c0_i32 = arith.constant 0 : i32
    %c0_i32_0 = arith.constant 0 : i32
    return %arg0, %c0_i32 : i32, i32
  }
  func.func @transform_1(%arg0: i32, %arg1: i32, %arg2: memref<2x2xi32, #tpu.memory_space<smem>>) -> (i32, i32) {
    %c0_i32 = arith.constant 0 : i32
    %c0_i32_0 = arith.constant 0 : i32
    return %arg1, %c0_i32 : i32, i32
  }
  func.func @transform_2(%arg0: i32, %arg1: i32, %arg2: memref<2x2xi32, #tpu.memory_space<smem>>) -> (i32, i32) {
    %c0_i32 = arith.constant 0 : i32
    return %arg0, %arg1 : i32, i32
  }
  func.func @transform_3(%arg0: i32, %arg1: i32, %arg2: memref<2x2xi32, #tpu.memory_space<smem>>) -> (i32, i32) {
    %c0_i32 = arith.constant 0 : i32
    %c0_i32_0 = arith.constant 0 : i32
    %c0_i32_1 = arith.constant 0 : i32
    return %c0_i32, %c0_i32_0 : i32, i32
  }
  func.func @transform_4(%arg0: i32, %arg1: i32, %arg2: memref<2x2xi32, #tpu.memory_space<smem>>) -> (i32, i32) {
    %c0_i32 = arith.constant 0 : i32
    %c0_i32_0 = arith.constant 0 : i32
    %c0_i32_1 = arith.constant 0 : i32
    return %c0_i32, %c0_i32_0 : i32, i32
  }
  func.func @transform_5(%arg0: i32, %arg1: i32, %arg2: memref<2x2xi32, #tpu.memory_space<smem>>) -> (i32, i32) {
    %c0_i32 = arith.constant 0 : i32
    %c0_i32_0 = arith.constant 0 : i32
    %c0_i32_1 = arith.constant 0 : i32
    return %c0_i32, %c0_i32_0 : i32, i32
  }
  func.func @transform_6(%arg0: i32, %arg1: i32, %arg2: memref<2x2xi32, #tpu.memory_space<smem>>) -> (i32, i32) {
    %c0_i32 = arith.constant 0 : i32
    %c0_i32_0 = arith.constant 0 : i32
    return %arg0, %c0_i32 : i32, i32
  }
}

</mosaic_0001>

<bundles_post_ra>
// kernel: tpu_custom_call.1
= control target key start
LH: loop header
LB: loop body
LE: loop exit
PB: predicated region body
PF: predicated region fallthrough
CT: control target
= control target key end

     0   :  { %s3527_s0 = inlined_call_operand.vmem [shape: s32[2,2], index: 0, kind: input, shape index: {}]   ;;  %s3528_s1 = inlined_call_operand.vmem [shape: f32[256,32], index: 1, kind: input, shape index: {}]   ;;  %s3529_s2 = inlined_call_operand.vmem [shape: f32[256,32], index: 2, kind: input, shape index: {}]   ;;  %s3530_s3 = inlined_call_operand.vmem [shape: bf16[256,256], index: 3, kind: input, shape index: {}]   ;;  %s3531_s4 = inlined_call_operand.vmem [shape: f32[2,32], index: 4, kind: input, shape index: {}]   ;;  %s3532_s5 = inlined_call_operand.vmem [shape: f32[2,32], index: 5, kind: input, shape index: {}]   ;;  %s3533_s6 = inlined_call_operand.vmem [shape: f32[2,32], index: 6, kind: input, shape index: {}]   ;;  %s3534_s7 = inlined_call_operand.vmem [shape: f32[256,32], index: 7, kind: output, shape index: {}]  }
   0x1   :  { %s12_s26 = sshll.u32 %s3527_s0, 4  ;;  %s13_s26 = int_to_ptr.vmem [resolvable:$true] %s12_s26 }
   0x2   :  { %s2388_s27 = scalar_lea.vmem %s13_s26, 32  ;;  %p2393_p1 = scmp.lt.s32.totalorder %s13_s26, %s13_s26 }
   0x3   :  { %p2389_p0 = scmp.ne.s32.totalorder %s13_s26, %s2388_s27  ;;  %p2394_p2 = scmp.lt.s32.totalorder %s2388_s27, %s2388_s27 }
   0x5   :  { %p2395_p3 = por %p2394_p2, %p2393_p1 }
   0x7   :  { %p2396_p4 = pnand %p2395_p3, %p2389_p0 }
   0x9   :  { %2399 = shalt.err (!%p2396_p4)  }
   0xa   :  { %s2458_s28 = smov [#allocation4]  }
   0xb   :  { %15 = dma.vmem_to_smem %s13_s26, 32, %s2458_s28, [#allocation3] }
   0xc   :  { %2428 = dma.done.wait [#allocation3], 32 }
   0xd   :  { %2429 = vsyncadd [#allocation3], 4294967264 }
   0xe   :  { %17 = sfence }
   0xf   :  { %s2506_s29 = smov 0   ;;  %s2508_s30 = smov 0  }
  0x10   :  { %s2510_s8 = smov 0   ;;  %s2512_s0 = smov 0  }
  0x11   :  { %s2514_s9 = smov 0   ;;  %s2516_s10 = smov 0  }
  0x12   :  { %s2518_s11 = smov 0  }
  0x13 LB: > { %s32_s12 = sadd.s32 1, %s2448_s9  ;;  %s35_s13 = sadd.s32 1, %s2452_s10  ;;  %s2456_s11 = sphi %s2518_s11, %s23_s11   ;;  %s2452_s10 = sphi %s2516_s10, %s3540_s10   ;;  %s2448_s9 = sphi %s2514_s9, %s3539_s9   ;;  %s2444_s0 = sphi %s2512_s0, %s3538_s0   ;;  %s2440_s8 = sphi %s2510_s8, %s3537_s8   ;;  %s2436_s30 = sphi %s2508_s30, %s3536_s30   ;;  %s2432_s29 = sphi %s2506_s29, %s3535_s29  }
  0x14   : > { %p33_p5 = scmp.ge.s32.totalorder %s32_s12, 2  ;;  %p103_p6 = scmp.ne.s32.totalorder %s2436_s30, %s2432_s29 }
  0x15   : > { %p104_p7 = scmp.eq.s32.totalorder %s2456_s11, 0  ;;  %s96_s17 = sadd.s32 1, %s2436_s30 }
  0x16   : > { %s3542_s12 = smov (%p33_p5, %s32_s12), 0  ;;  %s3544_s13 = smov (!%p33_p5, %s35_s13), %s2452_s10 }
  0x17   : > { %p105_p8 = por %p104_p7, %p103_p6  ;;  %p37_p9 = scmp.ge.s32.totalorder %s3544_s13, 2 }
  0x18   : > { %s92_s14 = ssub.s32 %s2448_s9, %s3542_s12  ;;  %p1925_p11 = scmp.ge.s32.totalorder %s2456_s11, 4 }
  0x19   : > { %s3546_s13 = smov (%p37_p9, %s3544_s13), 0 }
  0x1a   : > { %s91_s15 = ssub.s32 %s2452_s10, %s3546_s13  ;;  %227 = sbr.rel (%p1925_p11) target bundleno = 47 (0x2f), region = 28 }
  0x1b   : > { %s93_s16 = sor.u32 %s92_s14, %s91_s15 }
  0x1c   : > { %p94_p10 = scmp.eq.s32.totalorder %s93_s16, 0 }
  0x1e   : > { %s2557_s18 = scalar_select %p94_p10, %s2436_s30, %s96_s17  }
  0x1f   : > { %248 = sbr.rel (!%p105_p8) target bundleno = 47 (0x2f), region = 40  ;;  %s250_s19 = sand.u32 (%p105_p8), 1, %s2436_s30  }
  0x20   : > { %s1977_s20 = sshll.u32 (%p105_p8), %s2452_s10, 5  ;;  %s1926_s21 = sshll.u32 (%p105_p8), %s250_s19, 6 }
  0x21   : > { %s255_s22 = sadd.s32 (%p105_p8), %s2448_s9, %s1977_s20  ;;  %s252_s27 = scalar_lea.vmem (%p105_p8), [#allocation5], %s1926_s21 }
  0x22   : > { %s1929_s23 = sshll.u32 (%p105_p8), %s255_s22, 2 }
  0x23   : > { %s2566_s26 = scalar_lea.vmem (%p105_p8), %s3530_s3, %s1929_s23 }
  0x24   : > { %v274_v0 = vld [vmem:[%s2566_s26] sm:$0xf]  ;;  %v276_v1 = vld [vmem:[%s2566_s26 + $0x8] sm:$0xf]  ;;  %v278_v2 = vld [vmem:[%s2566_s26 + $0x10] sm:$0xf] }
  0x25   : > { %275 = vst [vmem:[%s252_s27] sm:$0xf] %v274_v0  ;;  %277 = vst [vmem:[%s252_s27 + $0x4] sm:$0xf] %v276_v1  ;;  %v280_v3 = vld [vmem:[%s2566_s26 + $0x18] sm:$0xf] }
  0x26   : > { %279 = vst [vmem:[%s252_s27 + $0x8] sm:$0xf] %v278_v2  ;;  %v282_v4 = vld [vmem:[%s2566_s26 + $0x20] sm:$0xf]  ;;  %v284_v5 = vld [vmem:[%s2566_s26 + $0x28] sm:$0xf] }
  0x27   : > { %281 = vst [vmem:[%s252_s27 + $0xc] sm:$0xf] %v280_v3  ;;  %283 = vst [vmem:[%s252_s27 + $0x10] sm:$0xf] %v282_v4  ;;  %v286_v6 = vld [vmem:[%s2566_s26 + $0x30] sm:$0xf] }
  0x28   : > { %285 = vst [vmem:[%s252_s27 + $0x14] sm:$0xf] %v284_v5  ;;  %v288_v7 = vld [vmem:[%s2566_s26 + $0x38] sm:$0xf]  ;;  %v290_v8 = vld [vmem:[%s2566_s26 + $0x40] sm:$0xf] }
  0x29   : > { %287 = vst [vmem:[%s252_s27 + $0x18] sm:$0xf] %v286_v6  ;;  %289 = vst [vmem:[%s252_s27 + $0x1c] sm:$0xf] %v288_v7  ;;  %v292_v9 = vld [vmem:[%s2566_s26 + $0x48] sm:$0xf] }
  0x2a   : > { %291 = vst [vmem:[%s252_s27 + $0x20] sm:$0xf] %v290_v8  ;;  %v294_v10 = vld [vmem:[%s2566_s26 + $0x50] sm:$0xf]  ;;  %v296_v11 = vld [vmem:[%s2566_s26 + $0x58] sm:$0xf] }
  0x2b   : > { %293 = vst [vmem:[%s252_s27 + $0x24] sm:$0xf] %v292_v9  ;;  %295 = vst [vmem:[%s252_s27 + $0x28] sm:$0xf] %v294_v10  ;;  %v298_v12 = vld [vmem:[%s2566_s26 + $0x60] sm:$0xf] }
  0x2c   : > { %297 = vst [vmem:[%s252_s27 + $0x2c] sm:$0xf] %v296_v11  ;;  %v300_v13 = vld [vmem:[%s2566_s26 + $0x68] sm:$0xf]  ;;  %v302_v14 = vld [vmem:[%s2566_s26 + $0x70] sm:$0xf] }
  0x2d   : > { %299 = vst [vmem:[%s252_s27 + $0x30] sm:$0xf] %v298_v12  ;;  %301 = vst [vmem:[%s252_s27 + $0x34] sm:$0xf] %v300_v13  ;;  %v304_v15 = vld [vmem:[%s2566_s26 + $0x78] sm:$0xf] }
  0x2e   : > { %303 = vst [vmem:[%s252_s27 + $0x38] sm:$0xf] %v302_v14  ;;  %305 = vst [vmem:[%s252_s27 + $0x3c] sm:$0xf] %v304_v15 }
  0x2f PF: > { %p1930_p12 = scmp.ge.s32.totalorder %s2456_s11, 1  ;;  %p360_p13 = scmp.lt.s32.totalorder %s2456_s11, 5 }
  0x31   : > { %p361_p0 = pnand %p1930_p12, %p360_p13 }
  0x32   : > { %s367_s28 = sand.u32 (!%p361_p0), 1, %s2432_s29   ;;  %s1932_s14 = sshll.u32 (!%p361_p0), %s2444_s0, 4 }
  0x33   : > { %364 = sbr.rel (%p361_p0) target bundleno = 882 (0x372), region = 81  ;;  %s1931_s15 = sshll.u32 (!%p361_p0), %s367_s28, 6 }
  0x34   : > { %p407_p1 = scmp.lt.s32.totalorder (!%p361_p0), %s1932_s14, 31  ;;  %s1934_s16 = sshll.u32 (!%p361_p0), %s2440_s8, 4 }
  0x35   : > { %p413_p2 = scmp.lt.s32.totalorder (!%p361_p0), %s1934_s16, 31  ;;  %s2604_s28 = scalar_lea.vmem (!%p361_p0), [#allocation5], %s1931_s15 }
  0x36   : > { %p1938_p3 = scmp.ne.s32.totalorder (!%p361_p0), %s2440_s8, 0 }
  0x38   : > { %s3548_s14 = smov (!%p407_p1, %s1932_s14), 31  ;;  %s3550_s16 = smov (!%p413_p2, %s1934_s16), 31 }
  0x39   : > { %s1933_s17 = sshll.u32 %s3548_s14, 3  ;;  %s1935_s25 = sshll.u32 %s3550_s16, 3 }
  0x3a   : > { %s2592_s21 = scalar_lea.vmem %s3528_s1, %s1933_s17  ;;  %s2597_s24 = scalar_lea.vmem %s3534_s7, %s1933_s17 }
  0x3b   : > { %s2602_s27 = scalar_lea.vmem %s3529_s2, %s1935_s25  ;;  %429 = sbr.rel (%p1938_p3) target bundleno = 81 (0x51), region = 89 }
  0x40   : > { %vm430_vm0 = vcmask 269312   ;;  %v2459_v16 = vmov 0.0  }
  0x41   : > { %431 = vst.msk [vmem:[#allocation2] sm:$0xff] %vm430_vm0, %v2459_v16  ;;  %432 = vst.msk [vmem:[#allocation2 + $0x8] sm:$0xff] %vm430_vm0, %v2459_v16 }
  0x42   : > { %433 = vst.msk [vmem:[#allocation2 + $0x10] sm:$0xff] %vm430_vm0, %v2459_v16  ;;  %434 = vst.msk [vmem:[#allocation2 + $0x18] sm:$0xff] %vm430_vm0, %v2459_v16 }
  0x43   : > { %435 = vst.msk [vmem:[#allocation2 + $0x20] sm:$0xff] %vm430_vm0, %v2459_v16  ;;  %436 = vst.msk [vmem:[#allocation2 + $0x28] sm:$0xff] %vm430_vm0, %v2459_v16 }
  0x44   : > { %437 = vst.msk [vmem:[#allocation2 + $0x30] sm:$0xff] %vm430_vm0, %v2459_v16  ;;  %438 = vst.msk [vmem:[#allocation2 + $0x38] sm:$0xff] %vm430_vm0, %v2459_v16 }
  0x45   : > { %439 = vst.msk [vmem:[#allocation2 + $0x40] sm:$0xff] %vm430_vm0, %v2459_v16  ;;  %440 = vst.msk [vmem:[#allocation2 + $0x48] sm:$0xff] %vm430_vm0, %v2459_v16 }
  0x46   : > { %441 = vst.msk [vmem:[#allocation2 + $0x50] sm:$0xff] %vm430_vm0, %v2459_v16  ;;  %442 = vst.msk [vmem:[#allocation2 + $0x58] sm:$0xff] %vm430_vm0, %v2459_v16 }
  0x47   : > { %443 = vst.msk [vmem:[#allocation2 + $0x60] sm:$0xff] %vm430_vm0, %v2459_v16  ;;  %444 = vst.msk [vmem:[#allocation2 + $0x68] sm:$0xff] %vm430_vm0, %v2459_v16 }
  0x48   : > { %445 = vst.msk [vmem:[#allocation2 + $0x70] sm:$0xff] %vm430_vm0, %v2459_v16  ;;  %446 = vst.msk [vmem:[#allocation2 + $0x78] sm:$0xff] %vm430_vm0, %v2459_v16 }
  0x49   : > { %447 = vst.msk [vmem:[#allocation2 + $0x80] sm:$0xff] %vm430_vm0, %v2459_v16  ;;  %448 = vst.msk [vmem:[#allocation2 + $0x88] sm:$0xff] %vm430_vm0, %v2459_v16 }
  0x4a   : > { %449 = vst.msk [vmem:[#allocation2 + $0x90] sm:$0xff] %vm430_vm0, %v2459_v16  ;;  %450 = vst.msk [vmem:[#allocation2 + $0x98] sm:$0xff] %vm430_vm0, %v2459_v16 }
  0x4b   : > { %451 = vst.msk [vmem:[#allocation2 + $0xa0] sm:$0xff] %vm430_vm0, %v2459_v16  ;;  %452 = vst.msk [vmem:[#allocation2 + $0xa8] sm:$0xff] %vm430_vm0, %v2459_v16 }
  0x4c   : > { %453 = vst.msk [vmem:[#allocation2 + $0xb0] sm:$0xff] %vm430_vm0, %v2459_v16  ;;  %454 = vst.msk [vmem:[#allocation2 + $0xb8] sm:$0xff] %vm430_vm0, %v2459_v16 }
  0x4d   : > { %455 = vst.msk [vmem:[#allocation2 + $0xc0] sm:$0xff] %vm430_vm0, %v2459_v16  ;;  %456 = vst.msk [vmem:[#allocation2 + $0xc8] sm:$0xff] %vm430_vm0, %v2459_v16 }
  0x4e   : > { %457 = vst.msk [vmem:[#allocation2 + $0xd0] sm:$0xff] %vm430_vm0, %v2459_v16  ;;  %458 = vst.msk [vmem:[#allocation2 + $0xd8] sm:$0xff] %vm430_vm0, %v2459_v16 }
  0x4f   : > { %459 = vst.msk [vmem:[#allocation2 + $0xe0] sm:$0xff] %vm430_vm0, %v2459_v16  ;;  %460 = vst.msk [vmem:[#allocation2 + $0xe8] sm:$0xff] %vm430_vm0, %v2459_v16 }
  0x50   : > { %461 = vst.msk [vmem:[#allocation2 + $0xf0] sm:$0xff] %vm430_vm0, %v2459_v16  ;;  %462 = vst.msk [vmem:[#allocation2 + $0xf8] sm:$0xff] %vm430_vm0, %v2459_v16 }
  0x51 PF: > { %s463_s14 = sshra.s32 %s2440_s8, 7  ;;  %s468_s15 = sand.u32 127, %s2440_s8 }
  0x52   : > { %s465_s16 = sadd.s32 %s2444_s0, %s463_s14 }
  0x53   : > { %s1939_s17 = sshll.u32 %s465_s16, 7 }
  0x54   : > { %s469_s19 = sadd.s32 %s1939_s17, %s468_s15 }
  0x55   : > { %s470_s20 = sld [smem:[#allocation4 + %s469_s19]] }
  0x5b   : > { %p1940_p4 = scmp.eq.s32.totalorder %s470_s20, 0 }
  0x5d   : > { %474 = sbr.rel (%p1940_p4) target bundleno = 645 (0x285), region = 93 }
  0x62   : > { %v2643_v17 = vld [vmem:[%s2602_s27 + $0x78] sm:$0xff]  ;;  %vm546_vm1 = vcmask 261120   ;;  %v2460_v18 = vmov 0.0   ;;  %vm2461_vm2 = vmmov 0   ;;  %v2651_v19 = vld [vmem:[%s2602_s27 + $0x70] sm:$0xff]  ;;  %v685_v20 = vlaneseq  ;;  %v2657_v21 = vld [vmem:[%s2602_s27 + $0x68] sm:$0xff] }
  0x63   : > { %2066 = vmatprep.subr.mxu0 %v2460_v18  ;;  %2098 = vmatprep.mubr.msk.f32.mxu0 %vm2461_vm2, %v2460_v18  ;;  %v2662_v22 = vld [vmem:[%s3531_s4] sm:$0x3]  ;;  %v2685_v28 = vld [vmem:[%s2602_s27 + $0x58] sm:$0xff]  ;;  %v2689_v30 = vld [vmem:[%s2592_s21 + $0x10] sm:$0xff]  ;;  %vm1018_vm3 = vcmask 269312  }
  0x64   : > { %2067 = vmatpush3.xpose.msk.msra.mxu0 %vm546_vm1, %v2643_v17  ;;  %v540_v23 = vld [vmem:[%s3532_s5] sm:$0x3]  ;;  %v2667_v24 = vshrl.u32 %v685_v20, 7  ;;  %v2695_v32 = vld [vmem:[%s2592_s21 + $0x18] sm:$0xff]  ;;  %v2703_v34 = vld [vmem:[%s2592_s21 + $0x8] sm:$0xff] }
  0x65   : > { %2068 = vmatprep.subr.mxu0 %v2460_v18  ;;  %v2673_v25 = vld [vmem:[%s2602_s27 + $0x60] sm:$0xff]  ;;  %v2676_v26 = vmul.f32 %v540_v23, %v2662_v22  ;;  %v2709_v35 = vld [vmem:[%s2602_s27 + $0x50] sm:$0xff]  ;;  %v2720_v40 = vld [vmem:[%s2592_s21 + $0x28] sm:$0xff] }
  0x66   : > { %v2679_v27 = vsub.s32 0, %v2667_v24  ;;  %v2692_v31 = vld [vmem:[%s2592_s21] sm:$0xff]  ;;  %v2731_v44 = vld [vmem:[%s2602_s27 + $0x48] sm:$0xff]  ;;  %v2740_v49 = vld [vmem:[%s2592_s21 + $0x38] sm:$0xff]  ;;  %v2802_v8 = vsub.s32 1, %v2667_v24 }
  0x67   : > { %v542_v29 = vsub.f32 0.0, %v2676_v26  ;;  %v2725_v43 = vld [vmem:[%s2592_s21 + $0x20] sm:$0xff]  ;;  %v2743_v50 = vld [vmem:[%s2592_s21 + $0x30] sm:$0xff]  ;;  %v2758_v56 = vld [vmem:[%s2592_s21 + $0x48] sm:$0xff] }
  0x68   : > { %2069 = vmatpush3.xpose.msk.msra.mxu0 %vm546_vm1, %v2651_v19  ;;  %v2749_v51 = vld [vmem:[%s2602_s27 + $0x40] sm:$0xff]  ;;  %v2767_v58 = vld [vmem:[%s2602_s27 + $0x38] sm:$0xff]  ;;  %v2779_v0 = vld [vmem:[%s2592_s21 + $0x50] sm:$0xff] }
  0x69   : > { %2070 = vmatprep.subr.mxu0 %v2460_v18  ;;  %v2700_v33 = vrot.slane %v542_v29, %v2679_v27  ;;  %v2761_v57 = vld [vmem:[%s2592_s21 + $0x40] sm:$0xff]  ;;  %v2776_v63 = vld [vmem:[%s2592_s21 + $0x58] sm:$0xff]  ;;  %v2785_v1 = vld [vmem:[%s2602_s27 + $0x30] sm:$0xff]  ;;  %v2832_v24 = vrot.slane %v542_v29, %v2802_v8 }
  0x6a   : > { %v2794_v6 = vld [vmem:[%s2592_s21 + $0x68] sm:$0xff]  ;;  %v2797_v7 = vld [vmem:[%s2592_s21 + $0x60] sm:$0xff]  ;;  %v2815_v14 = vld [vmem:[%s2592_s21 + $0x78] sm:$0xff] }
  0x6b   : > { %v691_v36 = vmul.f32 %v2700_v33, %v2689_v30  ;;  %v689_v37 = vmul.f32 %v2700_v33, %v2692_v31  ;;  %v692_v38 = vmul.f32 %v2700_v33, %v2695_v32  ;;  %v690_v39 = vmul.f32 %v2700_v33, %v2703_v34  ;;  %v2806_v9 = vld [vmem:[%s2602_s27 + $0x28] sm:$0xff]  ;;  %v2818_v15 = vld [vmem:[%s2592_s21 + $0x70] sm:$0xff]  ;;  %v2824_v16 = vld [vmem:[%s2602_s27 + $0x20] sm:$0xff] }
  0x6c   : > { %2071 = vmatpush3.xpose.msk.msra.mxu0 %vm546_vm1, %v2657_v21  ;;  %v694_v46 = vmul.f32 %v2700_v33, %v2720_v40  ;;  %v693_v48 = vmul.f32 %v2700_v33, %v2725_v43  ;;  %v696_v53 = vmul.f32 %v2700_v33, %v2740_v49  ;;  %v695_v55 = vmul.f32 %v2700_v33, %v2743_v50 }
  0x6d   : > { %2072 = vmatprep.subr.mxu0 %v2460_v18  ;;  %v711_v41 = vsel %vm546_vm1, %v691_v36, 0.0  ;;  %v705_v42 = vsel %vm546_vm1, %v689_v37, 0.0  ;;  %v714_v45 = vsel %vm546_vm1, %v692_v38, 0.0  ;;  %v708_v47 = vsel %vm546_vm1, %v690_v39, 0.0  ;;  %v2841_v38 = vld [vmem:[%s2602_s27 + $0x18] sm:$0xff] }
  0x6e   : > { %712 = vadd.xlane.f32.xlu1 %v711_v41  ;;  %706 = vadd.xlane.f32.xlu0 %v705_v42  ;;  %v720_v52 = vsel %vm546_vm1, %v694_v46, 0.0  ;;  %v717_v54 = vsel %vm546_vm1, %v693_v48, 0.0  ;;  %v726_v59 = vsel %vm546_vm1, %v696_v53, 0.0  ;;  %v698_v60 = vmul.f32 %v2700_v33, %v2758_v56  ;;  %v2853_v41 = vld [vmem:[%s2602_s27 + $0x10] sm:$0xff]  ;;  %v543_v46 = vld [vmem:[%s3533_s6] sm:$0x3] }
  0x6f   : > { %v723_v61 = vsel %vm546_vm1, %v695_v55, 0.0  ;;  %v697_v62 = vmul.f32 %v2700_v33, %v2761_v57  ;;  %v700_v3 = vmul.f32 %v2700_v33, %v2776_v63  ;;  %v699_v5 = vmul.f32 %v2700_v33, %v2779_v0 }
  0x70   : > { %2073 = vmatpush3.xpose.msk.msra.mxu0 %vm546_vm1, %v2673_v25  ;;  %v732_v2 = vsel %vm546_vm1, %v698_v60, 0.0  ;;  %v702_v11 = vmul.f32 %v2700_v33, %v2794_v6  ;;  %v701_v13 = vmul.f32 %v2700_v33, %v2797_v7  ;;  %v704_v23 = vmul.f32 %v2700_v33, %v2815_v14 }
  0x71   : > { %2074 = vmatprep.subr.mxu0 %v2460_v18  ;;  %v729_v4 = vsel %vm546_vm1, %v697_v62, 0.0  ;;  %v738_v10 = vsel %vm546_vm1, %v700_v3, 0.0  ;;  %v735_v12 = vsel %vm546_vm1, %v699_v5, 0.0  ;;  %v703_v37 = vmul.f32 %v2700_v33, %v2818_v15 }
  0x72   : > { %715 = vadd.xlane.f32.xlu1 %v714_v45  ;;  %709 = vadd.xlane.f32.xlu0 %v708_v47  ;;  %v744_v20 = vsel %vm546_vm1, %v702_v11, 0.0  ;;  %v741_v36 = vsel %vm546_vm1, %v701_v13, 0.0  ;;  %v750_v39 = vsel %vm546_vm1, %v704_v23, 0.0  ;;  %v1040_v26 = vmul.f32 %v2832_v24, %v2703_v34  ;;  %v2868_v47 = vld [vmem:[%s2602_s27 + $0x8] sm:$0xff] }
  0x73   : > { %v747_v29 = vsel %vm546_vm1, %v703_v37, 0.0  ;;  %v1039_v33 = vmul.f32 %v2832_v24, %v2692_v31  ;;  %v1042_v34 = vmul.f32 %v2832_v24, %v2695_v32  ;;  %v1041_v31 = vmul.f32 %v2832_v24, %v2689_v30 }
  0x74   : > { %2075 = vmatpush3.xpose.msk.msra.mxu0 %vm546_vm1, %v2685_v28  ;;  %v1058_v42 = vsel %vm546_vm1, %v1040_v26, 0.0  ;;  %v1044_v48 = vmul.f32 %v2832_v24, %v2720_v40  ;;  %v544_v53 = vmul.f32 %v543_v46, %v2662_v22  ;;  %v1046_v40 = vmul.f32 %v2832_v24, %v2740_v49 }
  0x75   : > { %2076 = vmatprep.subr.mxu0 %v2460_v18  ;;  %v1055_v45 = vsel %vm546_vm1, %v1039_v33, 0.0  ;;  %v1064_v32 = vsel %vm546_vm1, %v1042_v34, 0.0  ;;  %v1061_v30 = vsel %vm546_vm1, %v1041_v31, 0.0  ;;  %v1047_v49 = vmul.f32 %v2832_v24, %v2761_v57 }
  0x76   : > { %721 = vadd.xlane.f32.xlu1 %v720_v52  ;;  %718 = vadd.xlane.f32.xlu0 %v717_v54  ;;  %v1043_v52 = vmul.f32 %v2832_v24, %v2725_v43  ;;  %v2881_v54 = vld [vmem:[%s2602_s27] sm:$0xff]  ;;  %v1070_v55 = vsel %vm546_vm1, %v1044_v48, 0.0  ;;  %v1045_v43 = vmul.f32 %v2832_v24, %v2743_v50  ;;  %v545_v60 = vsub.f32 0.0, %v544_v53 }
  0x77   : > { %v1079_v3 = vsel %vm546_vm1, %v1047_v49, 0.0  ;;  %v1052_v57 = vmul.f32 %v2832_v24, %v2794_v6  ;;  %v1054_v11 = vmul.f32 %v2832_v24, %v2815_v14  ;;  %v684_v6 = vsel %vm546_vm1, %v2662_v22, 1.0 }
  0x78   : > { %2077 = vmatpush3.xpose.msk.msra.mxu0 %vm546_vm1, %v2709_v35  ;;  %v1073_v62 = vsel %vm546_vm1, %v1045_v43, 0.0  ;;  %v683_v23 = vsel %vm546_vm1, %v2643_v17, 1.0  ;;  %v682_v14 = vsel %vm546_vm1, %v2651_v19, 1.0  ;;  %v681_v22 = vsel %vm546_vm1, %v2657_v21, 1.0 }
  0x79   : > { %2078 = vmatprep.subr.mxu0 %v2460_v18  ;;  %v1100_v13 = vsel %vm546_vm1, %v1054_v11, 0.0  ;;  %v680_v37 = vsel %vm546_vm1, %v2673_v25, 1.0  ;;  %v679_v17 = vsel %vm546_vm1, %v2685_v28, 1.0  ;;  %v677_v34 = vsel %vm546_vm1, %v2731_v44, 1.0 }
  0x7a   : > { %727 = vadd.xlane.f32.xlu1 %v726_v59  ;;  %724 = vadd.xlane.f32.xlu0 %v723_v61  ;;  %v1067_v59 = vsel %vm546_vm1, %v1043_v52, 0.0  ;;  %v1048_v61 = vmul.f32 %v2832_v24, %v2758_v56  ;;  %v676_v21 = vsel %vm546_vm1, %v2749_v51, 1.0  ;;  %v675_v25 = vsel %vm546_vm1, %v2767_v58, 1.0 }
  0x7b   : > { %v673_v28 = vsel %vm546_vm1, %v2806_v9, 1.0  ;;  %v669_v31 = vsel %vm546_vm1, %v2868_v47, 1.0 }
  0x7c   : > { %2079 = vmatpush3.xpose.msk.msra.mxu0 %vm546_vm1, %v2731_v44  ;;  %v1082_v50 = vsel %vm546_vm1, %v1048_v61, 0.0  ;;  %v671_v44 = vsel %vm546_vm1, %v2841_v38, 1.0 }
  0x7d   : > { %2080 = vmatprep.subr.mxu0 %v2460_v18 }
  0x7e   : > { %733 = vadd.xlane.f32.xlu1 %v732_v2  ;;  %730 = vadd.xlane.f32.xlu0 %v729_v4  ;;  %v1050_v2 = vmul.f32 %v2832_v24, %v2776_v63  ;;  %v1049_v4 = vmul.f32 %v2832_v24, %v2779_v0  ;;  %v1094_v63 = vsel %vm546_vm1, %v1052_v57, 0.0 }
  0x80   : > { %2081 = vmatpush3.xpose.msk.msra.mxu0 %vm546_vm1, %v2749_v51  ;;  %v1088_v56 = vsel %vm546_vm1, %v1050_v2, 0.0  ;;  %v1085_v5 = vsel %vm546_vm1, %v1049_v4, 0.0  ;;  %v670_v51 = vsel %vm546_vm1, %v2853_v41, 1.0 }
  0x81   : > { %2082 = vmatprep.subr.mxu0 %v2460_v18 }
  0x82   : > { %739 = vadd.xlane.f32.xlu1 %v738_v10  ;;  %736 = vadd.xlane.f32.xlu0 %v735_v12  ;;  %v1051_v10 = vmul.f32 %v2832_v24, %v2797_v7  ;;  %v1053_v12 = vmul.f32 %v2832_v24, %v2818_v15  ;;  %v856_v7 = vrot.slane %v684_v6, %v2679_v27 }
  0x84   : > { %2083 = vmatpush3.xpose.msk.msra.mxu0 %vm546_vm1, %v2767_v58  ;;  %v1091_v0 = vsel %vm546_vm1, %v1051_v10, 0.0  ;;  %v872_v15 = vmul.f32 %v856_v7, %v683_v23  ;;  %v871_v24 = vmul.f32 %v856_v7, %v682_v14  ;;  %v869_v26 = vmul.f32 %v856_v7, %v680_v37 }
  0x85   : > { %2084 = vmatprep.subr.mxu0 %v2460_v18  ;;  %v868_v33 = vmul.f32 %v856_v7, %v679_v17  ;;  %v866_v58 = vmul.f32 %v856_v7, %v677_v34  ;;  %v865_v46 = vmul.f32 %v856_v7, %v676_v21  ;;  %v859_v53 = vmul.f32 %v856_v7, %v670_v51 }
  0x86   : > { %745 = vadd.xlane.f32.xlu1 %v744_v20  ;;  %742 = vadd.xlane.f32.xlu0 %v741_v36  ;;  %v1097_v20 = vsel %vm546_vm1, %v1053_v12, 0.0  ;;  %v880_v36 = vpack.c.bf16 %v872_v15, %v871_v24 }
  0x88   : > { %2085 = vmatpush3.xpose.msk.msra.mxu0 %vm546_vm1, %v2785_v1  ;;  %2101 = vmatprep.subr.bf16.mxu1 %v880_v36 }
  0x89   : > { %2086 = vmatprep.subr.mxu0 %v2460_v18  ;;  %2102 = vmatpush3.bf16.msra.mxu1 %v880_v36 }
  0x8a   : > { %751 = vadd.xlane.f32.xlu1 %v750_v39  ;;  %748 = vadd.xlane.f32.xlu0 %v747_v29  ;;  %v870_v39 = vmul.f32 %v856_v7, %v681_v22  ;;  %v678_v29 = vsel %vm546_vm1, %v2709_v35, 1.0  ;;  %v672_v35 = vsel %vm546_vm1, %v2824_v16, 1.0 }
  0x8b   : > { %v861_v52 = vmul.f32 %v856_v7, %v672_v35 }
  0x8c   : > { %2087 = vmatpush3.xpose.msk.msra.mxu0 %vm546_vm1, %v2806_v9  ;;  %v879_v19 = vpack.c.bf16 %v870_v39, %v869_v26  ;;  %v864_v9 = vmul.f32 %v856_v7, %v675_v25 }
  0x8d   : > { %2088 = vmatprep.subr.mxu0 %v2460_v18 }
  0x8e   : > { %1059 = vadd.xlane.f32.xlu1 %v1058_v42  ;;  %1056 = vadd.xlane.f32.xlu0 %v1055_v45  ;;  %v867_v42 = vmul.f32 %v856_v7, %v678_v29  ;;  %v674_v45 = vsel %vm546_vm1, %v2785_v1, 1.0  ;;  %v668_v1 = vsel %vm546_vm1, %v2881_v54, 1.0 }
  0x8f   : > { %2103 = vmatprep.subr.bf16.mxu1 %v879_v19  ;;  %v863_v48 = vmul.f32 %v856_v7, %v674_v45 }
  0x90   : > { %2089 = vmatpush3.xpose.msk.msra.mxu0 %vm546_vm1, %v2824_v16  ;;  %2104 = vmatpush3.bf16.msra.mxu1 %v879_v19  ;;  %v860_v16 = vmul.f32 %v856_v7, %v671_v44 }
  0x91   : > { %2090 = vmatprep.subr.mxu0 %v2460_v18 }
  0x92   : > { %1065 = vadd.xlane.f32.xlu1 %v1064_v32  ;;  %1062 = vadd.xlane.f32.xlu0 %v1061_v30  ;;  %v878_v32 = vpack.c.bf16 %v868_v33, %v867_v42  ;;  %v862_v30 = vmul.f32 %v856_v7, %v673_v28 }
  0x94   : > { %2091 = vmatpush3.xpose.msk.msra.mxu0 %vm546_vm1, %v2841_v38  ;;  %2105 = vmatprep.subr.bf16.mxu1 %v878_v32  ;;  %v858_v38 = vmul.f32 %v856_v7, %v669_v31 }
  0x95   : > { %2092 = vmatprep.subr.mxu0 %v2460_v18  ;;  %2106 = vmatpush3.bf16.msra.mxu1 %v878_v32 }
  0x96   : > { %1071 = vadd.xlane.f32.xlu1 %v1070_v55  ;;  %1068 = vadd.xlane.f32.xlu0 %v1067_v59  ;;  %v857_v55 = vmul.f32 %v856_v7, %v668_v1  ;;  %v874_v59 = vpack.c.bf16 %v860_v16, %v859_v53 }
  0x98   : > { %2093 = vmatpush3.xpose.msk.msra.mxu0 %vm546_vm1, %v2853_v41  ;;  %v877_v41 = vpack.c.bf16 %v866_v58, %v865_v46  ;;  %v873_v43 = vpack.c.bf16 %v858_v38, %v857_v55  ;;  %v2998_v38 = vld [vmem:[%s2604_s28 + $0x8] sm:$0xff]   ;;  %v3001_v55 = vld [vmem:[%s2604_s28 + $0x10] sm:$0xff]  }
  0x99   : > { %2094 = vmatprep.subr.mxu0 %v2460_v18 }
  0x9a   : > { %1074 = vadd.xlane.f32.xlu0 %v1073_v62  ;;  %2107 = vmatprep.subr.bf16.mxu1 %v877_v41 }
  0x9b   : > { %2108 = vmatpush3.bf16.msra.mxu1 %v877_v41 }
  0x9c   : > { %2095 = vmatpush3.xpose.msk.msra.mxu0 %vm546_vm1, %v2868_v47  ;;  %v876_v47 = vpack.c.bf16 %v864_v9, %v863_v48  ;;  %v2993_v9 = vld [vmem:[%s2604_s28] sm:$0xff]  }
  0x9d   : > { %2096 = vmatprep.subr.mxu0 %v2460_v18  ;;  %v1076_v18 = vsel %vm546_vm1, %v1046_v40, 0.0  ;;  %v875_v40 = vpack.c.bf16 %v862_v30, %v861_v52 }
  0x9e   : > { %1077 = vadd.xlane.f32.xlu1 %v1076_v18  ;;  %1080 = vadd.xlane.f32.xlu0 %v1079_v3 }
  0x9f   : > { %2109 = vmatprep.subr.bf16.mxu1 %v876_v47 }
  0xa0   : > { %2097 = vmatpush3.xpose.msk.msra.mxu0 %vm546_vm1, %v2881_v54  ;;  %2110 = vmatpush3.bf16.msra.mxu1 %v876_v47  ;;  %v1206_v54 = vrot.slane %v684_v6, %v2802_v8 }
  0xa1   : > { %2111 = vmatprep.subr.bf16.mxu1 %v875_v40 }
  0xa2   : > { %1083 = vadd.xlane.f32.xlu1 %v1082_v50  ;;  %1086 = vadd.xlane.f32.xlu0 %v1085_v5  ;;  %v1221_v18 = vmul.f32 %v1206_v54, %v682_v14  ;;  %v1220_v62 = vmul.f32 %v1206_v54, %v681_v22  ;;  %v1219_v49 = vmul.f32 %v1206_v54, %v680_v37 }
  0xa3   : > { %2099 = vmatmul.mubr.msk.f32.vlgmr.msra.gmra.mxu0 %vm546_vm1, %v545_v60  ;;  %v1222_v60 = vmul.f32 %v1206_v54, %v683_v23  ;;  %v1218_v50 = vmul.f32 %v1206_v54, %v679_v17  ;;  %v1217_v2 = vmul.f32 %v1206_v54, %v678_v29  ;;  %v1216_v4 = vmul.f32 %v1206_v54, %v677_v34 }
  0xa4   : > { %2112 = vmatpush3.bf16.msra.mxu1 %v875_v40  ;;  %v2957_v3 = vpack.c.bf16 %v1220_v62, %v1219_v49  ;;  %v1214_v5 = vmul.f32 %v1206_v54, %v675_v25  ;;  %v1213_v10 = vmul.f32 %v1206_v54, %v674_v45  ;;  %v1212_v11 = vmul.f32 %v1206_v54, %v673_v28 }
  0xa5   : > { %2113 = vmatprep.subr.bf16.mxu1 %v874_v59  ;;  %v2954_v61 = vpack.c.bf16 %v1222_v60, %v1221_v18  ;;  %v2959_v57 = vpack.c.bf16 %v1218_v50, %v1217_v2  ;;  %v1210_v6 = vmul.f32 %v1206_v54, %v671_v44  ;;  %v1207_v23 = vmul.f32 %v1206_v54, %v668_v1 }
  0xa6   : > { %1089 = vadd.xlane.f32.xlu1 %v1088_v56  ;;  %1092 = vadd.xlane.f32.xlu0 %v1091_v0  ;;  %v1215_v56 = vmul.f32 %v1206_v54, %v676_v21  ;;  %v1211_v0 = vmul.f32 %v1206_v54, %v672_v35  ;;  %v2963_v12 = vpack.c.bf16 %v1214_v5, %v1213_v10  ;;  %v1980_v60 = vunpack.c.l.bf16 %v2993_v9 }
  0xa7   : > { %v1981_v18 = vunpack.c.h.bf16 %v2993_v9  ;;  %v1984_v50 = vunpack.c.l.bf16 %v2998_v38  ;;  %v1985_v2 = vunpack.c.h.bf16 %v2998_v38 }
  0xa8   : > { %2114 = vmatpush3.bf16.msra.mxu1 %v874_v59  ;;  %v2965_v7 = vpack.c.bf16 %v1212_v11, %v1211_v0 }
  0xa9   : > { %2115 = vmatprep.subr.bf16.mxu1 %v873_v43 }
  0xaa   : > { %1095 = vadd.xlane.f32.xlu1 %v1094_v63  ;;  %1098 = vadd.xlane.f32.xlu0 %v1097_v20  ;;  %v2961_v63 = vpack.c.bf16 %v1216_v4, %v1215_v56  ;;  %v1208_v20 = vmul.f32 %v1206_v54, %v669_v31  ;;  %v1988_v4 = vunpack.c.l.bf16 %v3001_v55 }
  0xac   : > { %2116 = vmatpush3.bf16.msra.mxu1 %v873_v43  ;;  %v2969_v15 = vpack.c.bf16 %v1208_v20, %v1207_v23 }
  0xad   : > { %2133 = vmatprep.subr.bf16.mxu1 %v2954_v61 }
  0xae   : > { %1101 = vadd.xlane.f32.xlu1 %v1100_v13  ;;  %v1209_v13 = vmul.f32 %v1206_v54, %v670_v51 }
  0xb0   : > { %v2967_v14 = vpack.c.bf16 %v1210_v6, %v1209_v13 }
  0xf7   : > { %v707_v24 = vpop.xlane.xlu0 %706  ;;  %v713_v36 = vpop.xlane.xlu1 %712 }
  0xfb   : > { %v710_v22 = vpop.xlane.xlu0 %709  ;;  %v716_v37 = vpop.xlane.xlu1 %715 }
  0xff   : > { %v719_v39 = vpop.xlane.xlu0 %718  ;;  %v722_v26 = vpop.xlane.xlu1 %721 }
 0x103   : > { %v725_v17 = vpop.xlane.xlu0 %724  ;;  %v728_v29 = vpop.xlane.xlu1 %727 }
 0x107   : > { %v731_v19 = vpop.xlane.xlu0 %730  ;;  %v734_v33 = vpop.xlane.xlu1 %733 }
 0x10b   : > { %v2971_v42 = vpop.xlane.xlu0 %736  ;;  %v2973_v34 = vpop.xlane.xlu1 %739 }
 0x10f   : > { %v2975_v21 = vpop.xlane.xlu0 %742  ;;  %v2977_v25 = vpop.xlane.xlu1 %745 }
 0x113   : > { %v2979_v45 = vpop.xlane.xlu0 %748  ;;  %v2981_v28 = vpop.xlane.xlu1 %751 }
 0x117   : > { %v2990_v32 = vpop.xlane.xlu0 %1056  ;;  %v2995_v30 = vpop.xlane.xlu1 %1059 }
 0x11b   : > { %v1063_v56 = vpop.xlane.xlu0 %1062  ;;  %v1066_v0 = vpop.xlane.xlu1 %1065 }
 0x163   : > { %v664_v35 = vpop.f32.mrf.mxu0 }
 0x164   : > { %v2984_v44 = vrot.slane %v664_v35, %v2679_v27  ;;  %v3006_v40 = vrot.slane %v664_v35, %v2802_v8  ;;  %v1989_v8 = vunpack.c.h.bf16 %v3001_v55 }
 0x165   : > { %v2100_v51 = vpop.f32.mrf.mxu0 }
 0x166   : > { %v757_v31 = vadd.f32 %v2984_v44, %v707_v24  ;;  %v758_v58 = vadd.f32 %v2984_v44, %v710_v22  ;;  %v759_v46 = vadd.f32 %v2984_v44, %v713_v36  ;;  %v760_v1 = vadd.f32 %v2984_v44, %v716_v37 }
 0x167   : > { %v761_v41 = vadd.f32 %v2984_v44, %v719_v39  ;;  %v762_v47 = vadd.f32 %v2984_v44, %v722_v26  ;;  %v3015_v13 = vadd.f32 %v3006_v40, %v1063_v56  ;;  %v763_v20 = vadd.f32 %v2984_v44, %v725_v17 }
 0x168   : > { %v773_v48 = vmul.f32 0.2, %v757_v31  ;;  %v774_v52 = vmul.f32 0.2, %v758_v58  ;;  %v775_v16 = vmul.f32 0.2, %v759_v46  ;;  %v764_v23 = vadd.f32 %v2984_v44, %v728_v29 }
 0x169   : > { %v776_v27 = vmul.f32 0.2, %v760_v1  ;;  %v777_v10 = vmul.f32 0.2, %v761_v41  ;;  %v778_v11 = vmul.f32 0.2, %v762_v47  ;;  %v765_v22 = vadd.f32 %v2984_v44, %v731_v19 }
 0x16a   : > { %v789_v53 = vmin.f32 %v757_v31, %v773_v48  ;;  %v790_v59 = vmin.f32 %v758_v58, %v774_v52  ;;  %v791_v43 = vmin.f32 %v759_v46, %v775_v16  ;;  %v779_v37 = vmul.f32 0.2, %v763_v20  ;;  %v3028_v52 = vpop.xlane.xlu1 %1071 }
 0x16b   : > { %v792_v54 = vmin.f32 %v760_v1, %v776_v27  ;;  %v793_v24 = vmin.f32 %v761_v41, %v777_v10  ;;  %v794_v36 = vmin.f32 %v762_v47, %v778_v11  ;;  %v780_v39 = vmul.f32 0.2, %v764_v23 }
 0x16c   : > { %v805_v62 = vmul.f32 1.442695, %v789_v53  ;;  %v807_v49 = vmul.f32 1.442695, %v790_v59  ;;  %v809_v5 = vmul.f32 1.442695, %v791_v43  ;;  %v766_v26 = vadd.f32 %v2984_v44, %v734_v33  ;;  %v1069_v33 = vpop.xlane.xlu0 %1068 }
 0x16d   : > { %v811_v6 = vmul.f32 1.442695, %v792_v54  ;;  %v813_v35 = vmul.f32 1.442695, %v793_v24  ;;  %v815_v51 = vmul.f32 1.442695, %v794_v36  ;;  %v795_v58 = vmin.f32 %v763_v20, %v779_v37 }
 0x16e   : > { %2226 = vpow2.f32 %v805_v62  ;;  %v781_v31 = vmul.f32 0.2, %v765_v22  ;;  %v796_v46 = vmin.f32 %v764_v23, %v780_v39  ;;  %v782_v17 = vmul.f32 0.2, %v766_v26 }
 0x16f   : > { %2228 = vpow2.f32 %v807_v49  ;;  %v3022_v29 = vadd.f32 %v3006_v40, %v1066_v0  ;;  %v767_v19 = vadd.f32 %v2984_v44, %v2971_v42  ;;  %v768_v48 = vadd.f32 %v2984_v44, %v2973_v34 }
 0x170   : > { %2230 = vpow2.f32 %v809_v5  ;;  %v797_v1 = vmin.f32 %v765_v22, %v781_v31  ;;  %v3031_v16 = vmul.f32 0.2, %v3015_v13  ;;  %v817_v27 = vmul.f32 1.442695, %v795_v58  ;;  %v1075_v23 = vpop.xlane.xlu0 %1074 }
 0x171   : > { %2232 = vpow2.f32 %v811_v6  ;;  %v819_v53 = vmul.f32 1.442695, %v796_v46  ;;  %v798_v41 = vmin.f32 %v766_v26, %v782_v17  ;;  %v783_v59 = vmul.f32 0.2, %v767_v19 }
 0x172   : > { %2234 = vpow2.f32 %v813_v35  ;;  %v821_v47 = vmul.f32 1.442695, %v797_v1  ;;  %v784_v43 = vmul.f32 0.2, %v768_v48  ;;  %v769_v42 = vadd.f32 %v2984_v44, %v2975_v21  ;;  %v3041_v21 = vpop.xlane.xlu1 %1077 }
 0x173   : > { %2236 = vpow2.f32 %v815_v51  ;;  %v823_v54 = vmul.f32 1.442695, %v798_v41  ;;  %v770_v34 = vadd.f32 %v2984_v44, %v2977_v25  ;;  %v799_v62 = vmin.f32 %v767_v19, %v783_v59  ;;  %v3058_v19 = vld [vmem:[%s2604_s28 + $0x20] sm:$0xff]  }
 0x174   : > { %2238 = vpow2.f32 %v817_v27  ;;  %v800_v49 = vmin.f32 %v768_v48, %v784_v43  ;;  %v771_v56 = vadd.f32 %v2984_v44, %v2979_v45  ;;  %v785_v5 = vmul.f32 0.2, %v769_v42  ;;  %v1081_v43 = vpop.xlane.xlu0 %1080 }
 0x175   : > { %2240 = vpow2.f32 %v819_v53  ;;  %v786_v10 = vmul.f32 0.2, %v770_v34  ;;  %v772_v11 = vadd.f32 %v2984_v44, %v2981_v28  ;;  %v825_v0 = vmul.f32 1.442695, %v799_v62 }
 0x176   : > { %2242 = vpow2.f32 %v821_v47  ;;  %v827_v6 = vmul.f32 1.442695, %v800_v49  ;;  %v787_v20 = vmul.f32 0.2, %v771_v56  ;;  %v801_v25 = vmin.f32 %v769_v42, %v785_v5  ;;  %v1084_v59 = vpop.xlane.xlu1 %1083 }
 0x177   : > { %2244 = vpow2.f32 %v823_v54  ;;  %v802_v24 = vmin.f32 %v770_v34, %v786_v10  ;;  %v788_v36 = vmul.f32 0.2, %v772_v11  ;;  %v3044_v22 = vmul.f32 0.2, %v3022_v29 }
 0x178   : > { %v803_v45 = vmin.f32 %v771_v56, %v787_v20  ;;  %v1107_v28 = vadd.f32 %v3006_v40, %v2990_v32  ;;  %v1108_v44 = vadd.f32 %v3006_v40, %v2995_v30  ;;  %2246 = vpow2.f32 %v825_v0  ;;  %v3055_v32 = vld [vmem:[%s2604_s28 + $0x18] sm:$0xff]  }
 0x179   : > { %v829_v39 = vmul.f32 1.442695, %v801_v25  ;;  %v831_v26 = vmul.f32 1.442695, %v802_v24  ;;  %v804_v35 = vmin.f32 %v772_v11, %v788_v36  ;;  %2248 = vpow2.f32 %v827_v6 }
 0x17a   : > { %v1123_v58 = vmul.f32 0.2, %v1107_v28  ;;  %v1124_v46 = vmul.f32 0.2, %v1108_v44  ;;  %v833_v30 = vmul.f32 1.442695, %v803_v45  ;;  %v1111_v48 = vadd.f32 %v3006_v40, %v1069_v33 }
 0x17b   : > { %v2227_v37 = vpop.eup %2226  ;;  %2250 = vpow2.f32 %v829_v39  ;;  %v835_v34 = vmul.f32 1.442695, %v804_v35  ;;  %v1112_v62 = vadd.f32 %v3006_v40, %v3028_v52  ;;  %v1992_v49 = vunpack.c.l.bf16 %v3055_v32  ;;  %v1087_v35 = vpop.xlane.xlu0 %1086 }
 0x17c   : > { %v2229_v51 = vpop.eup %2228  ;;  %v837_v31 = vmul.f32 %v2227_v37, %v1980_v60  ;;  %2252 = vpow2.f32 %v831_v26  ;;  %v1139_v41 = vmin.f32 %v1107_v28, %v1123_v58  ;;  %v1140_v47 = vmin.f32 %v1108_v44, %v1124_v46  ;;  %v1090_v26 = vpop.xlane.xlu1 %1089 }
 0x17d   : > { %v2231_v17 = vpop.eup %2230  ;;  %v838_v1 = vmul.f32 %v2229_v51, %v1981_v18  ;;  %v1993_v33 = vunpack.c.h.bf16 %v3055_v32  ;;  %v1996_v56 = vunpack.c.l.bf16 %v3058_v19  ;;  %v1997_v0 = vunpack.c.h.bf16 %v3058_v19 }
 0x17e   : > { %v2233_v27 = vpop.eup %2232  ;;  %v839_v53 = vmul.f32 %v2231_v17, %v1984_v50  ;;  %v1155_v5 = vmul.f32 1.442695, %v1139_v41  ;;  %v1127_v6 = vmul.f32 0.2, %v1111_v48  ;;  %v1128_v20 = vmul.f32 0.2, %v1112_v62 }
 0x17f   : > { %v897_v54 = vpack.c.bf16 %v838_v1, %v837_v31  ;;  %v840_v42 = vmul.f32 %v2233_v27, %v1985_v2  ;;  %v2235_v10 = vpop.eup %2234  ;;  %v1141_v24 = vmin.f32 %v3015_v13, %v3031_v16  ;;  %2254 = vpow2.f32 %v833_v30  ;;  %v3101_v1 = vld [vmem:[%s2604_s28 + $0x30] sm:$0xff]  }
 0x180   : > { %v2237_v25 = vpop.eup %2236  ;;  %v841_v52 = vmul.f32 %v2235_v10, %v1988_v4  ;;  %v1157_v36 = vmul.f32 1.442695, %v1140_v47  ;;  %v1142_v28 = vmin.f32 %v3022_v29, %v3044_v22  ;;  %2256 = vpow2.f32 %v835_v34 }
 0x181   : > { %2117 = vmatprep.mubr.bf16.mxu1 %v897_v54  ;;  %v898_v11 = vpack.c.bf16 %v840_v42, %v839_v53  ;;  %v2239_v45 = vpop.eup %2238  ;;  %v842_v44 = vmul.f32 %v2237_v25, %v1989_v8  ;;  %v3080_v37 = vadd.f32 %v3006_v40, %v1075_v23  ;;  %2258 = vpow2.f32 %v1155_v5 }
 0x182   : > { %v2241_v39 = vpop.eup %2240  ;;  %v843_v13 = vmul.f32 %v2239_v45, %v1992_v49  ;;  %v1143_v16 = vmin.f32 %v1111_v48, %v1127_v6  ;;  %v3087_v29 = vadd.f32 %v3006_v40, %v3041_v21  ;;  %v1144_v31 = vmin.f32 %v1112_v62, %v1128_v20 }
 0x183   : > { %2118 = vmatmul.mubr.bf16.vlgmr.msra.gmra.mxu1 %v898_v11  ;;  %v2243_v22 = vpop.eup %2242  ;;  %v899_v51 = vpack.c.bf16 %v842_v44, %v841_v52  ;;  %v844_v23 = vmul.f32 %v2241_v39, %v1993_v33  ;;  %v3096_v58 = vadd.f32 %v3006_v40, %v1081_v43  ;;  %v1159_v17 = vmul.f32 1.442695, %v1141_v24  ;;  %v1096_v24 = vpop.xlane.xlu1 %1095 }
 0x184   : > { %2134 = vmatpush3.bf16.msra.mxu1 %v2954_v61  ;;  %v3093_v61 = vld [vmem:[%s2604_s28 + $0x28] sm:$0xff]   ;;  %v2245_v46 = vpop.eup %2244  ;;  %v845_v21 = vmul.f32 %v2243_v22, %v1996_v56  ;;  %2260 = vpow2.f32 %v1157_v36  ;;  %v1161_v30 = vmul.f32 1.442695, %v1142_v28  ;;  %v1129_v27 = vmul.f32 0.2, %v3080_v37  ;;  %v1093_v52 = vpop.xlane.xlu0 %1092 }
 0x185   : > { %2135 = vmatprep.subr.bf16.mxu1 %v2957_v3  ;;  %2121 = vmatprep.mubr.bf16.mxu1 %v899_v51  ;;  %v846_v48 = vmul.f32 %v2245_v46, %v1997_v0  ;;  %v1116_v53 = vadd.f32 %v3006_v40, %v1084_v59  ;;  %v2247_v41 = vpop.eup %2246  ;;  %v2000_v47 = vunpack.c.l.bf16 %v3093_v61  ;;  %v2001_v43 = vunpack.c.h.bf16 %v3093_v61 }
 0x186   : > { %v1163_v54 = vmul.f32 1.442695, %v1143_v16  ;;  %v1130_v42 = vmul.f32 0.2, %v3087_v29  ;;  %v2249_v34 = vpop.eup %2248  ;;  %v900_v62 = vpack.c.bf16 %v844_v23, %v843_v13  ;;  %v2004_v5 = vunpack.c.l.bf16 %v3101_v1  ;;  %v3126_v16 = vld [vmem:[%s2604_s28 + $0x38] sm:$0xff]  }
 0x187   : > { %v1165_v10 = vmul.f32 1.442695, %v1144_v31  ;;  %v1131_v11 = vmul.f32 0.2, %v3096_v58  ;;  %2262 = vpow2.f32 %v1159_v17  ;;  %v901_v6 = vpack.c.bf16 %v846_v48, %v845_v21  ;;  %v1102_v48 = vpop.xlane.xlu1 %1101 }
 0x188   : > { %2136 = vmatpush3.bf16.msra.mxu1 %v2957_v3  ;;  %v2251_v59 = vpop.eup %2250  ;;  %v2005_v3 = vunpack.c.h.bf16 %v3101_v1  ;;  %v1132_v20 = vmul.f32 0.2, %v1116_v53  ;;  %2264 = vpow2.f32 %v1161_v30  ;;  %v1145_v36 = vmin.f32 %v3080_v37, %v1129_v27  ;;  %v1099_v27 = vpop.xlane.xlu0 %1098 }
 0x189   : > { %2137 = vmatprep.subr.bf16.mxu1 %v2959_v57  ;;  %v2253_v25 = vpop.eup %2252  ;;  %v1117_v45 = vadd.f32 %v3006_v40, %v1087_v35  ;;  %v847_v28 = vmul.f32 %v2247_v41, %v2000_v47  ;;  %2266 = vpow2.f32 %v1163_v54  ;;  %v1146_v44 = vmin.f32 %v3087_v29, %v1130_v42 }
 0x18a   : > { %v1118_v39 = vadd.f32 %v3006_v40, %v1090_v26  ;;  %v848_v13 = vmul.f32 %v2249_v34, %v2001_v43  ;;  %2268 = vpow2.f32 %v1165_v10  ;;  %v1147_v37 = vmin.f32 %v3096_v58, %v1131_v11 }
 0x18b   : > { %2122 = vmatmul.mubr.bf16.gmra.mxu1 %v900_v62  ;;  %v849_v22 = vmul.f32 %v2251_v59, %v2004_v5  ;;  %v850_v29 = vmul.f32 %v2253_v25, %v2005_v3  ;;  %v1148_v35 = vmin.f32 %v1116_v53, %v1132_v20  ;;  %v1120_v26 = vadd.f32 %v3006_v40, %v1096_v24 }
 0x18c   : > { %2138 = vmatpush3.bf16.msra.mxu1 %v2959_v57  ;;  %2125 = vmatprep.mubr.bf16.mxu1 %v901_v6  ;;  %v1119_v57 = vadd.f32 %v3006_v40, %v1093_v52  ;;  %v2255_v51 = vpop.eup %2254  ;;  %v1167_v23 = vmul.f32 1.442695, %v1145_v36  ;;  %v1133_v31 = vmul.f32 0.2, %v1117_v45  ;;  %v2008_v17 = vunpack.c.l.bf16 %v3126_v16 }
 0x18d   : > { %2139 = vmatprep.subr.bf16.mxu1 %v2961_v63  ;;  %v2257_v46 = vpop.eup %2256  ;;  %v1169_v58 = vmul.f32 1.442695, %v1146_v44  ;;  %v1134_v21 = vmul.f32 0.2, %v1118_v39  ;;  %v902_v41 = vpack.c.bf16 %v848_v13, %v847_v28  ;;  %v2009_v53 = vunpack.c.h.bf16 %v3126_v16  ;;  %v887_v16 = vld [vmem:[#allocation2 + $0x30] sm:$0xff] }
 0x18e   : > { %v2259_v30 = vpop.eup %2258  ;;  %v1171_v54 = vmul.f32 1.442695, %v1147_v37  ;;  %v1135_v42 = vmul.f32 0.2, %v1119_v57  ;;  %v903_v34 = vpack.c.bf16 %v850_v29, %v849_v22  ;;  %v1173_v62 = vmul.f32 1.442695, %v1148_v35 }
 0x18f   : > { %v1136_v10 = vmul.f32 0.2, %v1120_v26  ;;  %2270 = vpow2.f32 %v1167_v23  ;;  %v1122_v59 = vadd.f32 %v3006_v40, %v1102_v48  ;;  %v1121_v6 = vadd.f32 %v3006_v40, %v1099_v27 }
 0x190   : > { %2140 = vmatpush3.bf16.msra.mxu1 %v2961_v63  ;;  %v1149_v63 = vmin.f32 %v1117_v45, %v1133_v31  ;;  %2272 = vpow2.f32 %v1169_v58  ;;  %v1150_v20 = vmin.f32 %v1118_v39, %v1134_v21  ;;  %v851_v25 = vmul.f32 %v2255_v51, %v2008_v17 }
 0x191   : > { %2141 = vmatprep.subr.bf16.mxu1 %v2963_v12  ;;  %v2261_v11 = vpop.eup %2260  ;;  %v852_v24 = vmul.f32 %v2257_v46, %v2009_v53  ;;  %2274 = vpow2.f32 %v1171_v54  ;;  %v1151_v52 = vmin.f32 %v1119_v57, %v1135_v42  ;;  %v1187_v36 = vmul.f32 %v2259_v30, %v1980_v60 }
 0x192   : > { %v1188_v40 = vmul.f32 %v2261_v11, %v1981_v18  ;;  %2276 = vpow2.f32 %v1173_v62  ;;  %v1175_v28 = vmul.f32 1.442695, %v1149_v63  ;;  %v1138_v39 = vmul.f32 0.2, %v1122_v59 }
 0x193   : > { %2126 = vmatmul.mubr.bf16.gmra.mxu1 %v902_v41  ;;  %v1177_v13 = vmul.f32 1.442695, %v1150_v20  ;;  %v1137_v22 = vmul.f32 0.2, %v1121_v6  ;;  %v904_v57 = vpack.c.bf16 %v852_v24, %v851_v25  ;;  %v1179_v29 = vmul.f32 1.442695, %v1151_v52 }
 0x194   : > { %2142 = vmatpush3.bf16.msra.mxu1 %v2963_v12  ;;  %2129 = vmatprep.mubr.bf16.mxu1 %v903_v34  ;;  %v1152_v12 = vmin.f32 %v1120_v26, %v1136_v10  ;;  %v2263_v45 = vpop.eup %2262  ;;  %v1248_v60 = vpack.c.bf16 %v1188_v40, %v1187_v36  ;;  %2278 = vpow2.f32 %v1175_v28  ;;  %v1154_v9 = vmin.f32 %v1122_v59, %v1138_v39  ;;  %v884_v59 = vld [vmem:[#allocation2 + $0x18] sm:$0xff]  ;;  %v882_v25 = vld [vmem:[#allocation2 + $0x8] sm:$0xff]  ;;  %v885_v36 = vld [vmem:[#allocation2 + $0x20] sm:$0xff] }
 0x195   : > { %2143 = vmatprep.subr.bf16.mxu1 %v2965_v7  ;;  %v2265_v44 = vpop.eup %2264  ;;  %2280 = vpow2.f32 %v1177_v13  ;;  %v1153_v18 = vmin.f32 %v1121_v6, %v1137_v22  ;;  %v886_v39 = vld [vmem:[#allocation2 + $0x28] sm:$0xff]  ;;  %v891_v22 = vld [vmem:[#allocation2 + $0x50] sm:$0xff] }
 0x196   : > { %v2267_v37 = vpop.eup %2266  ;;  %v1181_v51 = vmul.f32 1.442695, %v1152_v12  ;;  %v1190_v26 = vmul.f32 %v2265_v44, %v1985_v2  ;;  %2282 = vpow2.f32 %v1179_v29  ;;  %v1185_v46 = vmul.f32 1.442695, %v1154_v9  ;;  %v892_v9 = vld [vmem:[#allocation2 + $0x58] sm:$0xff] }
 0x197   : > { %v2269_v35 = vpop.eup %2268  ;;  %v1191_v23 = vmul.f32 %v2267_v37, %v1988_v4  ;;  %v1183_v21 = vmul.f32 1.442695, %v1153_v18 }
 0x198   : > { %2144 = vmatpush3.bf16.msra.mxu1 %v2965_v7  ;;  %v1189_v7 = vmul.f32 %v2263_v45, %v1984_v50  ;;  %v1192_v31 = vmul.f32 %v2269_v35, %v1989_v8  ;;  %2284 = vpow2.f32 %v1181_v51  ;;  %v888_v45 = vld [vmem:[#allocation2 + $0x38] sm:$0xff]  ;;  %v889_v35 = vld [vmem:[#allocation2 + $0x40] sm:$0xff] }
 0x199   : > { %2145 = vmatprep.subr.bf16.mxu1 %v2967_v14  ;;  %2286 = vpow2.f32 %v1185_v46 }
 0x19a   : > { %v1249_v50 = vpack.c.bf16 %v1190_v26, %v1189_v7  ;;  %v1250_v38 = vpack.c.bf16 %v1192_v31, %v1191_v23  ;;  %2288 = vpow2.f32 %v1183_v21  ;;  %v890_v26 = vld [vmem:[#allocation2 + $0x48] sm:$0xff]  ;;  %v893_v21 = vld [vmem:[#allocation2 + $0x60] sm:$0xff] }
 0x19b   : > { %2130 = vmatmul.mubr.bf16.gmra.mxu1 %v904_v57 }
 0x19c   : > { %2146 = vmatpush3.bf16.msra.mxu1 %v2967_v14  ;;  %2149 = vmatprep.mubr.bf16.mxu1 %v1248_v60  ;;  %v2271_v14 = vpop.eup %2270 }
 0x19d   : > { %2147 = vmatprep.subr.bf16.mxu1 %v2969_v15  ;;  %v2273_v58 = vpop.eup %2272  ;;  %v1193_v4 = vmul.f32 %v2271_v14, %v1992_v49  ;;  %v895_v14 = vld [vmem:[#allocation2 + $0x70] sm:$0xff] }
 0x19e   : > { %v2275_v30 = vpop.eup %2274  ;;  %v1194_v55 = vmul.f32 %v2273_v58, %v1993_v33 }
 0x19f   : > { %v2277_v2 = vpop.eup %2276  ;;  %v1195_v8 = vmul.f32 %v2275_v30, %v1996_v56 }
 0x1a0   : > { %2148 = vmatpush3.bf16.msra.mxu1 %v2969_v15  ;;  %v1196_v15 = vmul.f32 %v2277_v2, %v1997_v0  ;;  %v1251_v41 = vpack.c.bf16 %v1194_v55, %v1193_v4  ;;  %v894_v55 = vld [vmem:[#allocation2 + $0x68] sm:$0xff] }
 0x1a1   : > { %v2279_v48 = vpop.eup %2278 }
 0x1a2   : > { %v2281_v27 = vpop.eup %2280  ;;  %v1252_v42 = vpack.c.bf16 %v1196_v15, %v1195_v8  ;;  %v1197_v49 = vmul.f32 %v2279_v48, %v2000_v47  ;;  %v1234_v48 = vld [vmem:[#allocation2 + $0x90] sm:$0xff] }
 0x1a3   : > { %2150 = vmatmul.mubr.bf16.vlgmr.msra.gmra.mxu1 %v1249_v50  ;;  %v2283_v54 = vpop.eup %2282  ;;  %v1198_v32 = vmul.f32 %v2281_v27, %v2001_v43  ;;  %v883_v43 = vld [vmem:[#allocation2 + $0x10] sm:$0xff] }
 0x1a4   : > { %2153 = vmatprep.mubr.bf16.mxu1 %v1250_v38  ;;  %v1199_v33 = vmul.f32 %v2283_v54, %v2004_v5  ;;  %v881_v5 = vld [vmem:[#allocation2] sm:$0xff]  ;;  %v896_v38 = vld [vmem:[#allocation2 + $0x78] sm:$0xff] }
 0x1a5   : > { %v2285_v34 = vpop.eup %2284  ;;  %v1253_v0 = vpack.c.bf16 %v1198_v32, %v1197_v49  ;;  %v1232_v54 = vld [vmem:[#allocation2 + $0x80] sm:$0xff]  ;;  %v1235_v49 = vld [vmem:[#allocation2 + $0x98] sm:$0xff] }
 0x1a6   : > { %v1200_v19 = vmul.f32 %v2285_v34, %v2005_v3  ;;  %v2287_v56 = vpop.eup %2286 }
 0x1a7   : > { %v2289_v62 = vpop.eup %2288  ;;  %v1202_v47 = vmul.f32 %v2287_v56, %v2009_v53 }
 0x1a8   : > { %v1254_v10 = vpack.c.bf16 %v1200_v19, %v1199_v33  ;;  %v1201_v11 = vmul.f32 %v2289_v62, %v2008_v17  ;;  %v1233_v19 = vld [vmem:[#allocation2 + $0x88] sm:$0xff]  ;;  %v1238_v62 = vld [vmem:[#allocation2 + $0xb0] sm:$0xff] }
 0x1aa   : > { %v1255_v61 = vpack.c.bf16 %v1202_v47, %v1201_v11  ;;  %v1236_v47 = vld [vmem:[#allocation2 + $0xa0] sm:$0xff] }
 0x1ab   : > { %2154 = vmatmul.mubr.bf16.gmra.mxu1 %v1251_v41 }
 0x1ac   : > { %2157 = vmatprep.mubr.bf16.mxu1 %v1252_v42 }
 0x1b3   : > { %2158 = vmatmul.mubr.bf16.gmra.mxu1 %v1253_v0 }
 0x1b4   : > { %2161 = vmatprep.mubr.bf16.mxu1 %v1254_v10 }
 0x1bb   : > { %2162 = vmatmul.mubr.bf16.gmra.mxu1 %v1255_v61 }
 0x243   : > { %v2119_v63 = vpop.f32.mrf.mxu1 }
 0x244   : > { %v1004_v1 = vadd.f32 %v2119_v63, %v883_v43  ;;  %v1239_v63 = vld [vmem:[#allocation2 + $0xb8] sm:$0xff] }
 0x245   : > { %v939_v3 = vpop.f32.mrf.mxu1 }
 0x246   : > { %1021 = vst.msk [vmem:[#allocation2 + $0x10] sm:$0xff] %vm1018_vm3, %v1004_v1  ;;  %v1002_v6 = vadd.f32 %v939_v3, %v881_v5  ;;  %v1237_v3 = vld [vmem:[#allocation2 + $0xa8] sm:$0xff] }
 0x247   : > { %v2120_v20 = vpop.f32.mrf.mxu1 }
 0x248   : > { %1019 = vst.msk [vmem:[#allocation2] sm:$0xff] %vm1018_vm3, %v1002_v6  ;;  %v1005_v17 = vadd.f32 %v2120_v20, %v884_v59  ;;  %v1242_v20 = vld [vmem:[#allocation2 + $0xd0] sm:$0xff] }
 0x249   : > { %v942_v24 = vpop.f32.mrf.mxu1 }
 0x24a   : > { %1022 = vst.msk [vmem:[#allocation2 + $0x18] sm:$0xff] %vm1018_vm3, %v1005_v17  ;;  %v1003_v53 = vadd.f32 %v942_v24, %v882_v25  ;;  %v1240_v24 = vld [vmem:[#allocation2 + $0xc0] sm:$0xff] }
 0x24b   : > { %v2123_v52 = vpop.f32.mrf.mxu1 }
 0x24c   : > { %1020 = vst.msk [vmem:[#allocation2 + $0x8] sm:$0xff] %vm1018_vm3, %v1003_v53  ;;  %v1008_v40 = vadd.f32 %v2123_v52, %v887_v16  ;;  %v1243_v52 = vld [vmem:[#allocation2 + $0xd8] sm:$0xff] }
 0x24d   : > { %v955_v12 = vpop.f32.mrf.mxu1 }
 0x24e   : > { %1025 = vst.msk [vmem:[#allocation2 + $0x30] sm:$0xff] %vm1018_vm3, %v1008_v40  ;;  %v1006_v28 = vadd.f32 %v955_v12, %v885_v36  ;;  %v1241_v12 = vld [vmem:[#allocation2 + $0xc8] sm:$0xff] }
 0x24f   : > { %v2124_v44 = vpop.f32.mrf.mxu1 }
 0x250   : > { %1023 = vst.msk [vmem:[#allocation2 + $0x20] sm:$0xff] %vm1018_vm3, %v1006_v28  ;;  %v1009_v13 = vadd.f32 %v2124_v44, %v888_v45  ;;  %v1246_v44 = vld [vmem:[#allocation2 + $0xf0] sm:$0xff] }
 0x251   : > { %v958_v37 = vpop.f32.mrf.mxu1 }
 0x252   : > { %1026 = vst.msk [vmem:[#allocation2 + $0x38] sm:$0xff] %vm1018_vm3, %v1009_v13  ;;  %v1007_v57 = vadd.f32 %v958_v37, %v886_v39  ;;  %v1244_v37 = vld [vmem:[#allocation2 + $0xe0] sm:$0xff] }
 0x253   : > { %v2127_v29 = vpop.f32.mrf.mxu1 }
 0x254   : > { %1024 = vst.msk [vmem:[#allocation2 + $0x28] sm:$0xff] %vm1018_vm3, %v1007_v57  ;;  %v1012_v60 = vadd.f32 %v2127_v29, %v891_v22  ;;  %v1247_v29 = vld [vmem:[#allocation2 + $0xf8] sm:$0xff] }
 0x255   : > { %v971_v51 = vpop.f32.mrf.mxu1 }
 0x256   : > { %1029 = vst.msk [vmem:[#allocation2 + $0x50] sm:$0xff] %vm1018_vm3, %v1012_v60  ;;  %v1010_v18 = vadd.f32 %v971_v51, %v889_v35  ;;  %v1245_v51 = vld [vmem:[#allocation2 + $0xe8] sm:$0xff] }
 0x257   : > { %v2128_v7 = vpop.f32.mrf.mxu1 }
 0x258   : > { %1027 = vst.msk [vmem:[#allocation2 + $0x40] sm:$0xff] %vm1018_vm3, %v1010_v18  ;;  %v1013_v23 = vadd.f32 %v2128_v7, %v892_v9 }
 0x259   : > { %v974_v31 = vpop.f32.mrf.mxu1 }
 0x25a   : > { %1030 = vst.msk [vmem:[#allocation2 + $0x58] sm:$0xff] %vm1018_vm3, %v1013_v23  ;;  %v1011_v46 = vadd.f32 %v974_v31, %v890_v26 }
 0x25b   : > { %v2131_v58 = vpop.f32.mrf.mxu1 }
 0x25c   : > { %1028 = vst.msk [vmem:[#allocation2 + $0x48] sm:$0xff] %vm1018_vm3, %v1011_v46  ;;  %v1016_v50 = vadd.f32 %v2131_v58, %v895_v14 }
 0x25d   : > { %v987_v30 = vpop.f32.mrf.mxu1 }
 0x25e   : > { %1033 = vst.msk [vmem:[#allocation2 + $0x70] sm:$0xff] %vm1018_vm3, %v1016_v50  ;;  %v1014_v2 = vadd.f32 %v987_v30, %v893_v21 }
 0x25f   : > { %v2132_v4 = vpop.f32.mrf.mxu1 }
 0x260   : > { %1031 = vst.msk [vmem:[#allocation2 + $0x60] sm:$0xff] %vm1018_vm3, %v1014_v2  ;;  %v1017_v8 = vadd.f32 %v2132_v4, %v896_v38 }
 0x261   : > { %v990_v15 = vpop.f32.mrf.mxu1 }
 0x262   : > { %1034 = vst.msk [vmem:[#allocation2 + $0x78] sm:$0xff] %vm1018_vm3, %v1017_v8  ;;  %v1015_v27 = vadd.f32 %v990_v15, %v894_v55 }
 0x263   : > { %v2151_v41 = vpop.f32.mrf.mxu1 }
 0x264   : > { %1032 = vst.msk [vmem:[#allocation2 + $0x68] sm:$0xff] %vm1018_vm3, %v1015_v27  ;;  %v1355_v42 = vadd.f32 %v2151_v41, %v1234_v48 }
 0x265   : > { %v1290_v34 = vpop.f32.mrf.mxu1 }
 0x266   : > { %1371 = vst.msk [vmem:[#allocation2 + $0x90] sm:$0xff] %vm1018_vm3, %v1355_v42  ;;  %v1353_v32 = vadd.f32 %v1290_v34, %v1232_v54 }
 0x267   : > { %v2152_v33 = vpop.f32.mrf.mxu1 }
 0x268   : > { %1369 = vst.msk [vmem:[#allocation2 + $0x80] sm:$0xff] %vm1018_vm3, %v1353_v32  ;;  %v1356_v56 = vadd.f32 %v2152_v33, %v1235_v49 }
 0x269   : > { %v1293_v0 = vpop.f32.mrf.mxu1 }
 0x26a   : > { %1372 = vst.msk [vmem:[#allocation2 + $0x98] sm:$0xff] %vm1018_vm3, %v1356_v56  ;;  %v1354_v10 = vadd.f32 %v1293_v0, %v1233_v19 }
 0x26b   : > { %v2155_v11 = vpop.f32.mrf.mxu1 }
 0x26c   : > { %1370 = vst.msk [vmem:[#allocation2 + $0x88] sm:$0xff] %vm1018_vm3, %v1354_v10  ;;  %v1359_v61 = vadd.f32 %v2155_v11, %v1238_v62 }
 0x26d   : > { %v1306_v43 = vpop.f32.mrf.mxu1 }
 0x26e   : > { %1375 = vst.msk [vmem:[#allocation2 + $0xb0] sm:$0xff] %vm1018_vm3, %v1359_v61  ;;  %v1357_v5 = vadd.f32 %v1306_v43, %v1236_v47 }
 0x26f   : > { %v2156_v1 = vpop.f32.mrf.mxu1 }
 0x270   : > { %1373 = vst.msk [vmem:[#allocation2 + $0xa0] sm:$0xff] %vm1018_vm3, %v1357_v5  ;;  %v1360_v59 = vadd.f32 %v2156_v1, %v1239_v63 }
 0x271   : > { %v1309_v6 = vpop.f32.mrf.mxu1 }
 0x272   : > { %1376 = vst.msk [vmem:[#allocation2 + $0xb8] sm:$0xff] %vm1018_vm3, %v1360_v59  ;;  %v1358_v25 = vadd.f32 %v1309_v6, %v1237_v3 }
 0x273   : > { %v2159_v17 = vpop.f32.mrf.mxu1 }
 0x274   : > { %1374 = vst.msk [vmem:[#allocation2 + $0xa8] sm:$0xff] %vm1018_vm3, %v1358_v25  ;;  %v1363_v16 = vadd.f32 %v2159_v17, %v1242_v20 }
 0x275   : > { %v1322_v53 = vpop.f32.mrf.mxu1 }
 0x276   : > { %1379 = vst.msk [vmem:[#allocation2 + $0xd0] sm:$0xff] %vm1018_vm3, %v1363_v16  ;;  %v1361_v36 = vadd.f32 %v1322_v53, %v1240_v24 }
 0x277   : > { %v2160_v40 = vpop.f32.mrf.mxu1 }
 0x278   : > { %1377 = vst.msk [vmem:[#allocation2 + $0xc0] sm:$0xff] %vm1018_vm3, %v1361_v36  ;;  %v1364_v45 = vadd.f32 %v2160_v40, %v1243_v52 }
 0x279   : > { %v1325_v28 = vpop.f32.mrf.mxu1 }
 0x27a   : > { %1380 = vst.msk [vmem:[#allocation2 + $0xd8] sm:$0xff] %vm1018_vm3, %v1364_v45  ;;  %v1362_v39 = vadd.f32 %v1325_v28, %v1241_v12 }
 0x27b   : > { %v2163_v13 = vpop.f32.mrf.mxu1 }
 0x27c   : > { %1378 = vst.msk [vmem:[#allocation2 + $0xc8] sm:$0xff] %vm1018_vm3, %v1362_v39  ;;  %v1367_v22 = vadd.f32 %v2163_v13, %v1246_v44 }
 0x27d   : > { %v1338_v57 = vpop.f32.mrf.mxu1 }
 0x27e   : > { %1383 = vst.msk [vmem:[#allocation2 + $0xf0] sm:$0xff] %vm1018_vm3, %v1367_v22  ;;  %v1365_v35 = vadd.f32 %v1338_v57, %v1244_v37 }
 0x27f   : > { %v2164_v60 = vpop.f32.mrf.mxu1 }
 0x280   : > { %1381 = vst.msk [vmem:[#allocation2 + $0xe0] sm:$0xff] %vm1018_vm3, %v1365_v35  ;;  %v1368_v9 = vadd.f32 %v2164_v60, %v1247_v29 }
 0x281   : > { %v1341_v18 = vpop.f32.mrf.mxu1 }
 0x282   : > { %1384 = vst.msk [vmem:[#allocation2 + $0xf8] sm:$0xff] %vm1018_vm3, %v1368_v9  ;;  %v1366_v7 = vadd.f32 %v1341_v18, %v1245_v51 }
 0x284   : > { %1382 = vst.msk [vmem:[#allocation2 + $0xe8] sm:$0xff] %vm1018_vm3, %v1366_v7 }
 0x285 PF: > { %p1958_p5 = scmp.ne.s32.totalorder %s2440_s8, 1 }
 0x287   : > { %1388 = sbr.rel (%p1958_p5) target bundleno = 882 (0x372), region = 97 }
 0x28c   : > { %v3217_v26 = vld [vmem:[#allocation2 + $0x10] sm:$0xff]  ;;  %v3219_v23 = vld [vmem:[#allocation2] sm:$0xff]  ;;  %v3221_v31 = vld [vmem:[#allocation2 + $0x18] sm:$0xff]  ;;  %v2462_v14 = vmov 32   ;;  %vm1645_vm4 = vcmask 261120  }
 0x28d   : > { %2291 = vset.pattern.permute.xlu1 %v2462_v14  ;;  %2290 = vset.pattern.permute.xlu0 %v2462_v14  ;;  %2292 = vrcp.f32 %v3217_v26  ;;  %v3224_v46 = vld [vmem:[#allocation2 + $0x8] sm:$0xff]  ;;  %v3231_v21 = vld [vmem:[#allocation2 + $0x20] sm:$0xff]  ;;  %v3235_v50 = vld [vmem:[#allocation2 + $0x38] sm:$0xff] }
 0x28e   : > { %2294 = vrcp.f32 %v3219_v23  ;;  %v3229_v58 = vld [vmem:[#allocation2 + $0x28] sm:$0xff]  ;;  %v3237_v30 = vld [vmem:[#allocation2 + $0x30] sm:$0xff]  ;;  %v3243_v2 = vld [vmem:[#allocation2 + $0x40] sm:$0xff] }
 0x28f   : > { %2296 = vrcp.f32 %v3221_v31  ;;  %v3241_v38 = vld [vmem:[#allocation2 + $0x48] sm:$0xff]  ;;  %v3247_v15 = vld [vmem:[#allocation2 + $0x58] sm:$0xff]  ;;  %v3249_v27 = vld [vmem:[#allocation2 + $0x50] sm:$0xff] }
 0x290   : > { %2298 = vrcp.f32 %v3224_v46  ;;  %v3253_v54 = vld [vmem:[#allocation2 + $0x68] sm:$0xff]  ;;  %v3255_v34 = vld [vmem:[#allocation2 + $0x60] sm:$0xff]  ;;  %v3259_v32 = vld [vmem:[#allocation2 + $0x78] sm:$0xff] }
 0x291   : > { %2300 = vrcp.f32 %v3229_v58  ;;  %v3261_v19 = vld [vmem:[#allocation2 + $0x70] sm:$0xff]  ;;  %v3265_v0 = vld [vmem:[#allocation2 + $0x88] sm:$0xff]  ;;  %v3267_v10 = vld [vmem:[#allocation2 + $0x80] sm:$0xff] }
 0x292   : > { %2302 = vrcp.f32 %v3231_v21  ;;  %v3271_v47 = vld [vmem:[#allocation2 + $0x98] sm:$0xff]  ;;  %v3273_v43 = vld [vmem:[#allocation2 + $0x90] sm:$0xff]  ;;  %v3277_v5 = vld [vmem:[#allocation2 + $0xa8] sm:$0xff] }
 0x293   : > { %2304 = vrcp.f32 %v3235_v50  ;;  %v3279_v3 = vld [vmem:[#allocation2 + $0xa0] sm:$0xff]  ;;  %v3283_v6 = vld [vmem:[#allocation2 + $0xb8] sm:$0xff]  ;;  %v3285_v25 = vld [vmem:[#allocation2 + $0xb0] sm:$0xff] }
 0x294   : > { %2306 = vrcp.f32 %v3237_v30  ;;  %v3289_v24 = vld [vmem:[#allocation2 + $0xc8] sm:$0xff]  ;;  %v3291_v53 = vld [vmem:[#allocation2 + $0xc0] sm:$0xff]  ;;  %v3295_v36 = vld [vmem:[#allocation2 + $0xd8] sm:$0xff] }
 0x295   : > { %2308 = vrcp.f32 %v3241_v38  ;;  %v3297_v12 = vld [vmem:[#allocation2 + $0xd0] sm:$0xff]  ;;  %v3301_v28 = vld [vmem:[#allocation2 + $0xe8] sm:$0xff]  ;;  %v3303_v39 = vld [vmem:[#allocation2 + $0xe0] sm:$0xff] }
 0x296   : > { %2310 = vrcp.f32 %v3243_v2  ;;  %v3307_v37 = vld [vmem:[#allocation2 + $0xf8] sm:$0xff]  ;;  %v3309_v57 = vld [vmem:[#allocation2 + $0xf0] sm:$0xff] }
 0x297   : > { %2312 = vrcp.f32 %v3247_v15 }
 0x298   : > { %2314 = vrcp.f32 %v3249_v27 }
 0x299   : > { %2316 = vrcp.f32 %v3253_v54 }
 0x29a   : > { %v2293_v4 = vpop.eup %2292  ;;  %2318 = vrcp.f32 %v3255_v34 }
 0x29b   : > { %v2295_v55 = vpop.eup %2294  ;;  %1465 = vperm.xlu1 %2291, %v2293_v4   ;;  %2320 = vrcp.f32 %v3259_v32 }
 0x29c   : > { %v2297_v8 = vpop.eup %2296  ;;  %1455 = vperm.xlu0 %2290, %v2295_v55   ;;  %2322 = vrcp.f32 %v3261_v19 }
 0x29d   : > { %v2299_v48 = vpop.eup %2298  ;;  %2324 = vrcp.f32 %v3265_v0 }
 0x29e   : > { %v2301_v41 = vpop.eup %2300  ;;  %2326 = vrcp.f32 %v3267_v10 }
 0x29f   : > { %1470 = vperm.xlu1 %2291, %v2297_v8   ;;  %v2303_v42 = vpop.eup %2302  ;;  %2328 = vrcp.f32 %v3271_v47 }
 0x2a0   : > { %1460 = vperm.xlu0 %2290, %v2299_v48   ;;  %v2305_v49 = vpop.eup %2304  ;;  %2330 = vrcp.f32 %v3273_v43 }
 0x2a1   : > { %v2307_v33 = vpop.eup %2306  ;;  %2332 = vrcp.f32 %v3277_v5 }
 0x2a2   : > { %v2309_v56 = vpop.eup %2308  ;;  %2334 = vrcp.f32 %v3279_v3 }
 0x2a3   : > { %1480 = vperm.xlu1 %2291, %v2301_v41   ;;  %v2311_v62 = vpop.eup %2310  ;;  %2336 = vrcp.f32 %v3283_v6 }
 0x2a4   : > { %1475 = vperm.xlu0 %2290, %v2303_v42   ;;  %v2313_v11 = vpop.eup %2312  ;;  %2338 = vrcp.f32 %v3285_v25 }
 0x2a5   : > { %v2315_v61 = vpop.eup %2314  ;;  %2340 = vrcp.f32 %v3289_v24 }
 0x2a6   : > { %v2317_v63 = vpop.eup %2316  ;;  %2342 = vrcp.f32 %v3291_v53 }
 0x2a7   : > { %1490 = vperm.xlu1 %2291, %v2305_v49   ;;  %v2319_v1 = vpop.eup %2318  ;;  %2344 = vrcp.f32 %v3295_v36 }
 0x2a8   : > { %1485 = vperm.xlu0 %2290, %v2307_v33   ;;  %v2321_v59 = vpop.eup %2320  ;;  %2346 = vrcp.f32 %v3297_v12 }
 0x2a9   : > { %v2323_v20 = vpop.eup %2322  ;;  %2348 = vrcp.f32 %v3301_v28 }
 0x2aa   : > { %v2325_v17 = vpop.eup %2324  ;;  %2350 = vrcp.f32 %v3303_v39 }
 0x2ab   : > { %1500 = vperm.xlu1 %2291, %v2309_v56   ;;  %v2327_v16 = vpop.eup %2326  ;;  %2352 = vrcp.f32 %v3307_v37 }
 0x2ac   : > { %1495 = vperm.xlu0 %2290, %v2311_v62   ;;  %v2329_v52 = vpop.eup %2328  ;;  %2354 = vrcp.f32 %v3309_v57 }
 0x2ad   : > { %v2331_v40 = vpop.eup %2330 }
 0x2ae   : > { %v2333_v45 = vpop.eup %2332 }
 0x2af   : > { %1510 = vperm.xlu1 %2291, %v2313_v11   ;;  %v2335_v44 = vpop.eup %2334 }
 0x2b0   : > { %1505 = vperm.xlu0 %2290, %v2315_v61   ;;  %v2337_v13 = vpop.eup %2336 }
 0x2b1   : > { %v2339_v22 = vpop.eup %2338 }
 0x2b2   : > { %v2341_v29 = vpop.eup %2340 }
 0x2b3   : > { %1520 = vperm.xlu1 %2291, %v2317_v63   ;;  %v2343_v35 = vpop.eup %2342 }
 0x2b4   : > { %1515 = vperm.xlu0 %2290, %v2319_v1   ;;  %v2345_v60 = vpop.eup %2344 }
 0x2b5   : > { %v2347_v51 = vpop.eup %2346 }
 0x2b6   : > { %v2349_v9 = vpop.eup %2348 }
 0x2b7   : > { %1530 = vperm.xlu1 %2291, %v2321_v59   ;;  %v2351_v18 = vpop.eup %2350 }
 0x2b8   : > { %1525 = vperm.xlu0 %2290, %v2323_v20   ;;  %v2353_v7 = vpop.eup %2352 }
 0x2b9   : > { %v2355_v14 = vpop.eup %2354 }
 0x2bb   : > { %1540 = vperm.xlu1 %2291, %v2325_v17  }
 0x2bc   : > { %1535 = vperm.xlu0 %2290, %v2327_v16  }
 0x2bf   : > { %1550 = vperm.xlu1 %2291, %v2329_v52  }
 0x2c0   : > { %1545 = vperm.xlu0 %2290, %v2331_v40  }
 0x2c3   : > { %1560 = vperm.xlu1 %2291, %v2333_v45  }
 0x2c4   : > { %1555 = vperm.xlu0 %2290, %v2335_v44  }
 0x2c7   : > { %1570 = vperm.xlu1 %2291, %v2337_v13  }
 0x2c8   : > { %1565 = vperm.xlu0 %2290, %v2339_v22  }
 0x2cb   : > { %1580 = vperm.xlu1 %2291, %v2341_v29  }
 0x2cc   : > { %1575 = vperm.xlu0 %2290, %v2343_v35  }
 0x2cf   : > { %1590 = vperm.xlu1 %2291, %v2345_v60  }
 0x2d0   : > { %1585 = vperm.xlu0 %2290, %v2347_v51  }
 0x2d3   : > { %1600 = vperm.xlu1 %2291, %v2349_v9  }
 0x2d4   : > { %1595 = vperm.xlu0 %2290, %v2351_v18  }
 0x2d7   : > { %1610 = vperm.xlu1 %2291, %v2353_v7  }
 0x2d8   : > { %1605 = vperm.xlu0 %2290, %v2355_v14  }
 0x316   : > { %v1466_v4 = vpop.permute.xlu1 %1465 }
 0x317   : > { %v1456_v55 = vpop.permute.xlu0 %1455  ;;  %v1615_v17 = vmul.f32 %v1466_v4, %v3217_v26 }
 0x318   : > { %v1613_v52 = vmul.f32 %v1456_v55, %v3219_v23 }
 0x319   : > { %v1652_v29 = vsel %vm1645_vm4, %v1615_v17, 0.0 }
 0x31a   : > { %v1471_v8 = vpop.permute.xlu1 %1470 }
 0x31b   : > { %v1461_v48 = vpop.permute.xlu0 %1460  ;;  %v1616_v45 = vmul.f32 %v1471_v8, %v3221_v31  ;;  %v1646_v31 = vsel %vm1645_vm4, %v1613_v52, 0.0 }
 0x31c   : > { %v1614_v16 = vmul.f32 %v1461_v48, %v3224_v46 }
 0x31e   : > { %v1481_v41 = vpop.permute.xlu1 %1480  ;;  %v1649_v26 = vsel %vm1645_vm4, %v1614_v16, 0.0 }
 0x31f   : > { %v1476_v42 = vpop.permute.xlu0 %1475  ;;  %v1618_v44 = vmul.f32 %v1481_v41, %v3229_v58 }
 0x320   : > { %v1617_v35 = vmul.f32 %v1476_v42, %v3231_v21  ;;  %v1655_v21 = vsel %vm1645_vm4, %v1616_v45, 0.0 }
 0x322   : > { %v1491_v49 = vpop.permute.xlu1 %1490 }
 0x323   : > { %v1486_v33 = vpop.permute.xlu0 %1485  ;;  %v1620_v46 = vmul.f32 %v1491_v49, %v3235_v50 }
 0x324   : > { %v1619_v23 = vmul.f32 %v1486_v33, %v3237_v30  ;;  %v1658_v30 = vsel %vm1645_vm4, %v1617_v35, 0.0 }
 0x325   : > { %v1667_v8 = vsel %vm1645_vm4, %v1620_v46, 0.0 }
 0x326   : > { %v1501_v56 = vpop.permute.xlu1 %1500  ;;  %v1664_v48 = vsel %vm1645_vm4, %v1619_v23, 0.0 }
 0x327   : > { %v1496_v62 = vpop.permute.xlu0 %1495  ;;  %v1622_v58 = vmul.f32 %v1501_v56, %v3241_v38 }
 0x328   : > { %v1621_v4 = vmul.f32 %v1496_v62, %v3243_v2 }
 0x329   : > { %v1673_v49 = vsel %vm1645_vm4, %v1622_v58, 0.0 }
 0x32a   : > { %v1511_v11 = vpop.permute.xlu1 %1510 }
 0x32b   : > { %v1506_v61 = vpop.permute.xlu0 %1505  ;;  %v1624_v62 = vmul.f32 %v1511_v11, %v3247_v15 }
 0x32d   : > { %v1679_v46 = vsel %vm1645_vm4, %v1624_v62, 0.0 }
 0x32e   : > { %v1521_v63 = vpop.permute.xlu1 %1520 }
 0x32f   : > { %v3313_v1 = vpop.permute.xlu0 %1515  ;;  %v1626_v11 = vmul.f32 %v1521_v63, %v3253_v54 }
 0x330   : > { %v1625_v63 = vmul.f32 %v3313_v1, %v3255_v34 }
 0x332   : > { %v3315_v59 = vpop.permute.xlu1 %1530 }
 0x333   : > { %v3317_v20 = vpop.permute.xlu0 %1525 }
 0x336   : > { %v1541_v40 = vpop.permute.xlu1 %1540 }
 0x337   : > { %v1630_v13 = vmul.f32 %v1541_v40, %v3265_v0  ;;  %v1536_v22 = vpop.permute.xlu0 %1535  ;;  %v1670_v40 = vsel %vm1645_vm4, %v1621_v4, 0.0 }
 0x338   : > { %v1629_v60 = vmul.f32 %v1536_v22, %v3267_v10  ;;  %v1661_v10 = vsel %vm1645_vm4, %v1618_v44, 0.0  ;;  %v1623_v22 = vmul.f32 %v1506_v61, %v3249_v27 }
 0x339   : > { %v1650_v51 = vsel %vm1645_vm4, %v1630_v13, 0.0 }
 0x33a   : > { %v1651_v0 = vadd.f32 %v1650_v51, %v1649_v26  ;;  %v1647_v9 = vsel %vm1645_vm4, %v1629_v60, 0.0  ;;  %v1551_v18 = vpop.permute.xlu1 %1550  ;;  %v3371_v54 = vsel %vm1645_vm4, %v1623_v22, 0.0 }
 0x33b   : > { %v1648_v7 = vadd.f32 %v1647_v9, %v1646_v31  ;;  %v1632_v14 = vmul.f32 %v1551_v18, %v3271_v47  ;;  %v1546_v50 = vpop.permute.xlu0 %1545  ;;  %v3377_v18 = vsel %vm1645_vm4, %v1626_v11, 0.0 }
 0x33c   : > { %v3340_v55 = vmul.f32 0.5, %v1651_v0  ;;  %v1631_v38 = vmul.f32 %v1546_v50, %v3273_v43 }
 0x33d   : > { %v3345_v41 = vmul.f32 0.5, %v1648_v7  ;;  %v1656_v42 = vsel %vm1645_vm4, %v1632_v14, 0.0 }
 0x33e   : > { %v1727_v47 = vmin.f32 %v3340_v55, 0.0  ;;  %v1657_v33 = vadd.f32 %v1656_v42, %v1655_v21  ;;  %v1653_v56 = vsel %vm1645_vm4, %v1631_v38, 0.0  ;;  %v1561_v2 = vpop.permute.xlu1 %1560  ;;  %v3389_v38 = vsel %vm1645_vm4, %v1625_v63, 0.0 }
 0x33f   : > { %v1726_v43 = vmin.f32 %v3345_v41, 0.0  ;;  %v1654_v17 = vadd.f32 %v1653_v56, %v1652_v29  ;;  %v1634_v16 = vmul.f32 %v1561_v2, %v3277_v5  ;;  %v1556_v52 = vpop.permute.xlu0 %1555  ;;  %vm1711_vm5 = vcmp.gt.f32.partialorder %v3340_v55, 0.0 }
 0x340   : > { %v1744_v45 = vmul.f32 1.442695, %v1727_v47  ;;  %v3355_v44 = vmul.f32 0.5, %v1657_v33  ;;  %v1633_v13 = vmul.f32 %v1556_v52, %v3279_v3  ;;  %vm1710_vm6 = vcmp.gt.f32.partialorder %v3345_v41, 0.0 }
 0x341   : > { %v1742_v35 = vmul.f32 1.442695, %v1726_v43  ;;  %v3359_v60 = vmul.f32 0.5, %v1654_v17  ;;  %v1662_v15 = vsel %vm1645_vm4, %v1634_v16, 0.0 }
 0x342   : > { %2356 = vpow2.f32 %v1744_v45  ;;  %v1729_v5 = vmin.f32 %v3355_v44, 0.0  ;;  %v1663_v29 = vadd.f32 %v1662_v15, %v1661_v10  ;;  %v1571_v26 = vpop.permute.xlu1 %1570  ;;  %v1659_v3 = vsel %vm1645_vm4, %v1633_v13, 0.0 }
 0x343   : > { %2358 = vpow2.f32 %v1742_v35  ;;  %v1728_v23 = vmin.f32 %v3359_v60, 0.0  ;;  %v1566_v27 = vpop.permute.xlu0 %1565  ;;  %v1660_v31 = vadd.f32 %v1659_v3, %v1658_v30  ;;  %v1636_v58 = vmul.f32 %v1571_v26, %v3283_v6 }
 0x344   : > { %v1748_v61 = vmul.f32 1.442695, %v1729_v5  ;;  %v3367_v51 = vmul.f32 0.5, %v1663_v29  ;;  %v1635_v9 = vmul.f32 %v1566_v27, %v3285_v25  ;;  %v1628_v25 = vmul.f32 %v3315_v59, %v3259_v32 }
 0x345   : > { %v1746_v0 = vmul.f32 1.442695, %v1728_v23  ;;  %v3380_v10 = vmul.f32 0.5, %v1660_v31  ;;  %v1668_v6 = vsel %vm1645_vm4, %v1636_v58, 0.0  ;;  %v3397_v32 = vmul.f32 %v3317_v20, %v3261_v19 }
 0x346   : > { %2360 = vpow2.f32 %v1748_v61  ;;  %v1731_v21 = vmin.f32 %v3367_v51, 0.0  ;;  %v1581_v7 = vpop.permute.xlu1 %1580  ;;  %v1665_v14 = vsel %vm1645_vm4, %v1635_v9, 0.0  ;;  %v1669_v4 = vadd.f32 %v1668_v6, %v1667_v8 }
 0x347   : > { %2362 = vpow2.f32 %v1746_v0  ;;  %v1638_v50 = vmul.f32 %v1581_v7, %v3289_v24  ;;  %v1576_v34 = vpop.permute.xlu0 %1575  ;;  %v1730_v30 = vmin.f32 %v3380_v10, 0.0  ;;  %v1666_v42 = vadd.f32 %v1665_v14, %v1664_v48 }
 0x348   : > { %v1752_v1 = vmul.f32 1.442695, %v1731_v21  ;;  %v1637_v33 = vmul.f32 %v1576_v34, %v3291_v53  ;;  %v3393_v2 = vmul.f32 0.5, %v1669_v4  ;;  %v3404_v17 = vsel %vm1645_vm4, %v1628_v25, 0.0 }
 0x349   : > { %v1674_v47 = vsel %vm1645_vm4, %v1638_v50, 0.0  ;;  %v1750_v56 = vmul.f32 1.442695, %v1730_v30  ;;  %v3399_v59 = vmul.f32 0.5, %v1666_v42  ;;  %vm1713_vm7 = vcmp.gt.f32.partialorder %v3355_v44, 0.0 }
 0x34a   : > { %2364 = vpow2.f32 %v1752_v1  ;;  %v1675_v24 = vadd.f32 %v1674_v47, %v1673_v49  ;;  %v1591_v62 = vpop.permute.xlu1 %1590  ;;  %v1671_v8 = vsel %vm1645_vm4, %v1637_v33, 0.0  ;;  %v1733_v53 = vmin.f32 %v3393_v2, 0.0 }
 0x34b   : > { %v1640_v48 = vmul.f32 %v1591_v62, %v3295_v36  ;;  %v1586_v43 = vpop.permute.xlu0 %1585  ;;  %2366 = vpow2.f32 %v1750_v56  ;;  %v1732_v19 = vmin.f32 %v3399_v59, 0.0  ;;  %v1672_v20 = vadd.f32 %v1671_v8, %v1670_v40 }
 0x34c   : > { %v3407_v16 = vmul.f32 0.5, %v1675_v24  ;;  %v1756_v52 = vmul.f32 1.442695, %v1733_v53  ;;  %v1639_v11 = vmul.f32 %v1586_v43, %v3297_v12  ;;  %vm1712_vm8 = vcmp.gt.f32.partialorder %v3359_v60, 0.0 }
 0x34d   : > { %v1680_v49 = vsel %vm1645_vm4, %v1640_v48, 0.0  ;;  %v1754_v35 = vmul.f32 1.442695, %v1732_v19  ;;  %v3414_v15 = vmul.f32 0.5, %v1672_v20  ;;  %vm1715_vm9 = vcmp.gt.f32.partialorder %v3367_v51, 0.0 }
 0x34e   : > { %v1735_v36 = vmin.f32 %v3407_v16, 0.0  ;;  %v1681_v45 = vadd.f32 %v1680_v49, %v1679_v46  ;;  %v1601_v13 = vpop.permute.xlu1 %1600  ;;  %2368 = vpow2.f32 %v1756_v52  ;;  %v1677_v0 = vsel %vm1645_vm4, %v1639_v11, 0.0 }
 0x34f   : > { %v2357_v22 = vpop.eup %2356  ;;  %v1642_v5 = vmul.f32 %v1601_v13, %v3301_v28  ;;  %v1596_v29 = vpop.permute.xlu0 %1595  ;;  %2370 = vpow2.f32 %v1754_v35  ;;  %v1734_v46 = vmin.f32 %v3414_v15, 0.0  ;;  %v1678_v6 = vadd.f32 %v1677_v0, %v3371_v54 }
 0x350   : > { %v2359_v40 = vpop.eup %2358  ;;  %v1960_v26 = vadd.f32 -1.0, %v2357_v22  ;;  %v1760_v23 = vmul.f32 1.442695, %v1735_v36  ;;  %v3418_v3 = vmul.f32 0.5, %v1681_v45  ;;  %vm1714_vm10 = vcmp.gt.f32.partialorder %v3380_v10, 0.0 }
 0x351   : > { %v1959_v27 = vadd.f32 -1.0, %v2359_v40  ;;  %v1758_v63 = vmul.f32 1.442695, %v1734_v46  ;;  %v1686_v9 = vsel %vm1645_vm4, %v1642_v5, 0.0  ;;  %v3443_v30 = vmul.f32 0.5, %v1678_v6 }
 0x352   : > { %v1791_v12 = vsel %vm1711_vm5, %v3340_v55, %v1960_v26  ;;  %2372 = vpow2.f32 %v1760_v23  ;;  %v1737_v28 = vmin.f32 %v3418_v3, 0.0  ;;  %v1611_v61 = vpop.permute.xlu1 %1610  ;;  %v1687_v14 = vadd.f32 %v1686_v9, %v3377_v18 }
 0x353   : > { %v2361_v31 = vpop.eup %2360  ;;  %1807 = vst.msk [vmem:[%s2597_s24 + $0x8] sm:$0xff] %vm1645_vm4, %v1791_v12  ;;  %v1790_v58 = vsel %vm1710_vm6, %v3345_v41, %v1959_v27  ;;  %v1606_v50 = vpop.permute.xlu0 %1605  ;;  %2374 = vpow2.f32 %v1758_v63  ;;  %v1641_v41 = vmul.f32 %v1596_v29, %v3303_v39  ;;  %v1644_v25 = vmul.f32 %v1611_v61, %v3307_v37 }
 0x354   : > { %v2363_v21 = vpop.eup %2362  ;;  %1806 = vst.msk [vmem:[%s2597_s24] sm:$0xff] %vm1645_vm4, %v1790_v58  ;;  %v1962_v55 = vadd.f32 -1.0, %v2361_v31  ;;  %v1764_v7 = vmul.f32 1.442695, %v1737_v28  ;;  %v3445_v4 = vmul.f32 0.5, %v1687_v14  ;;  %v1643_v42 = vmul.f32 %v1606_v50, %v3309_v57 }
 0x355   : > { %v1961_v34 = vadd.f32 -1.0, %v2363_v21  ;;  %v1683_v39 = vsel %vm1645_vm4, %v1641_v41, 0.0  ;;  %v1692_v37 = vsel %vm1645_vm4, %v1644_v25, 0.0  ;;  %v1736_v33 = vmin.f32 %v3443_v30, 0.0 }
 0x356   : > { %v1793_v1 = vsel %vm1713_vm7, %v3355_v44, %v1962_v55  ;;  %2376 = vpow2.f32 %v1764_v7  ;;  %v1688_v44 = vsel %vm1645_vm4, %v3397_v32, 0.0  ;;  %v1684_v24 = vadd.f32 %v1683_v39, %v3389_v38 }
 0x357   : > { %v2365_v54 = vpop.eup %2364  ;;  %1809 = vst.msk [vmem:[%s2597_s24 + $0x18] sm:$0xff] %vm1645_vm4, %v1793_v1  ;;  %v1792_v18 = vsel %vm1712_vm8, %v3359_v60, %v1961_v34  ;;  %v1739_v60 = vmin.f32 %v3445_v4, 0.0  ;;  %v1693_v62 = vadd.f32 %v1692_v37, %v3404_v17  ;;  %v1689_v57 = vsel %vm1645_vm4, %v1643_v42, 0.0 }
 0x358   : > { %1808 = vst.msk [vmem:[%s2597_s24 + $0x10] sm:$0xff] %vm1645_vm4, %v1792_v18  ;;  %v1964_v47 = vadd.f32 -1.0, %v2365_v54  ;;  %v2367_v56 = vpop.eup %2366  ;;  %v1762_v48 = vmul.f32 1.442695, %v1736_v33  ;;  %v1690_v43 = vadd.f32 %v1689_v57, %v1688_v44  ;;  %v1706_v19 = vmul.f32 0.5, %v1684_v24 }
 0x359   : > { %v1963_v32 = vadd.f32 -1.0, %v2367_v56  ;;  %v1768_v53 = vmul.f32 1.442695, %v1739_v60  ;;  %v1709_v20 = vmul.f32 0.5, %v1693_v62  ;;  %vm1717_vm11 = vcmp.gt.f32.partialorder %v3393_v2, 0.0 }
 0x35a   : > { %v1795_v8 = vsel %vm1715_vm9, %v3367_v51, %v1964_v47  ;;  %2378 = vpow2.f32 %v1762_v48  ;;  %v1708_v38 = vmul.f32 0.5, %v1690_v43  ;;  %v1738_v51 = vmin.f32 %v1706_v19, 0.0 }
 0x35b   : > { %1811 = vst.msk [vmem:[%s2597_s24 + $0x28] sm:$0xff] %vm1645_vm4, %v1795_v8  ;;  %v1794_v49 = vsel %vm1714_vm10, %v3380_v10, %v1963_v32  ;;  %v2369_v52 = vpop.eup %2368  ;;  %2380 = vpow2.f32 %v1768_v53  ;;  %v1741_v45 = vmin.f32 %v1709_v20, 0.0  ;;  %vm1716_vm12 = vcmp.gt.f32.partialorder %v3399_v59, 0.0 }
 0x35c   : > { %1810 = vst.msk [vmem:[%s2597_s24 + $0x20] sm:$0xff] %vm1645_vm4, %v1794_v49  ;;  %v2371_v17 = vpop.eup %2370  ;;  %v1966_v36 = vadd.f32 -1.0, %v2369_v52  ;;  %v1740_v13 = vmin.f32 %v1708_v38, 0.0  ;;  %v1766_v35 = vmul.f32 1.442695, %v1738_v51  ;;  %vm1719_vm13 = vcmp.gt.f32.partialorder %v3407_v16, 0.0 }
 0x35d   : > { %v1965_v10 = vadd.f32 -1.0, %v2371_v17  ;;  %v1772_v29 = vmul.f32 1.442695, %v1741_v45  ;;  %vm1718_vm14 = vcmp.gt.f32.partialorder %v3414_v15, 0.0  ;;  %vm1721_vm15 = vcmp.gt.f32.partialorder %v3418_v3, 0.0 }
 0x35e   : > { %v1797_v11 = vsel %vm1717_vm11, %v3393_v2, %v1966_v36  ;;  %v1770_v40 = vmul.f32 1.442695, %v1740_v13  ;;  %2382 = vpow2.f32 %v1766_v35  ;;  %vm1720_vm0 = vcmp.gt.f32.partialorder %v3443_v30, 0.0 }
 0x35f   : > { %v2373_v22 = vpop.eup %2372  ;;  %1813 = vst.msk [vmem:[%s2597_s24 + $0x38] sm:$0xff] %vm1645_vm4, %v1797_v11  ;;  %v1796_v26 = vsel %vm1716_vm12, %v3399_v59, %v1965_v10  ;;  %2384 = vpow2.f32 %v1772_v29  ;;  %vm1723_vm1 = vcmp.gt.f32.partialorder %v3445_v4, 0.0  ;;  %vm1722_vm2 = vcmp.gt.f32.partialorder %v1706_v19, 0.0 }
 0x360   : > { %v1968_v5 = vadd.f32 -1.0, %v2373_v22  ;;  %v2375_v23 = vpop.eup %2374  ;;  %1812 = vst.msk [vmem:[%s2597_s24 + $0x30] sm:$0xff] %vm1645_vm4, %v1796_v26  ;;  %2386 = vpow2.f32 %v1770_v40  ;;  %vm1725_vm3 = vcmp.gt.f32.partialorder %v1709_v20, 0.0  ;;  %vm1724_vm5 = vcmp.gt.f32.partialorder %v1708_v38, 0.0 }
 0x361   : > { %v1967_v2 = vadd.f32 -1.0, %v2375_v23 }
 0x362   : > { %v1799_v27 = vsel %vm1719_vm13, %v3407_v16, %v1968_v5 }
 0x363   : > { %v2377_v46 = vpop.eup %2376  ;;  %1815 = vst.msk [vmem:[%s2597_s24 + $0x48] sm:$0xff] %vm1645_vm4, %v1799_v27  ;;  %v1798_v59 = vsel %vm1718_vm14, %v3414_v15, %v1967_v2 }
 0x364   : > { %v1970_v12 = vadd.f32 -1.0, %v2377_v46  ;;  %1814 = vst.msk [vmem:[%s2597_s24 + $0x40] sm:$0xff] %vm1645_vm4, %v1798_v59 }
 0x366   : > { %v1801_v28 = vsel %vm1721_vm15, %v3418_v3, %v1970_v12 }
 0x367   : > { %1817 = vst.msk [vmem:[%s2597_s24 + $0x58] sm:$0xff] %vm1645_vm4, %v1801_v28  ;;  %v2379_v16 = vpop.eup %2378 }
 0x368   : > { %v2381_v61 = vpop.eup %2380  ;;  %v1969_v31 = vadd.f32 -1.0, %v2379_v16 }
 0x369   : > { %v1972_v58 = vadd.f32 -1.0, %v2381_v61 }
 0x36a   : > { %v1800_v63 = vsel %vm1720_vm0, %v3443_v30, %v1969_v31 }
 0x36b   : > { %1816 = vst.msk [vmem:[%s2597_s24 + $0x50] sm:$0xff] %vm1645_vm4, %v1800_v63  ;;  %v1803_v15 = vsel %vm1723_vm1, %v3445_v4, %v1972_v58  ;;  %v2383_v3 = vpop.eup %2382 }
 0x36c   : > { %1819 = vst.msk [vmem:[%s2597_s24 + $0x68] sm:$0xff] %vm1645_vm4, %v1803_v15  ;;  %v2385_v0 = vpop.eup %2384  ;;  %v1971_v9 = vadd.f32 -1.0, %v2383_v3 }
 0x36d   : > { %v2387_v21 = vpop.eup %2386  ;;  %v1974_v55 = vadd.f32 -1.0, %v2385_v0 }
 0x36e   : > { %v1802_v7 = vsel %vm1722_vm2, %v1706_v19, %v1971_v9  ;;  %v1973_v6 = vadd.f32 -1.0, %v2387_v21 }
 0x36f   : > { %1818 = vst.msk [vmem:[%s2597_s24 + $0x60] sm:$0xff] %vm1645_vm4, %v1802_v7  ;;  %v1805_v14 = vsel %vm1725_vm3, %v1709_v20, %v1974_v55 }
 0x370   : > { %1821 = vst.msk [vmem:[%s2597_s24 + $0x78] sm:$0xff] %vm1645_vm4, %v1805_v14  ;;  %v1804_v50 = vsel %vm1724_vm5, %v1708_v38, %v1973_v6 }
 0x371   : > { %1820 = vst.msk [vmem:[%s2597_s24 + $0x70] sm:$0xff] %vm1645_vm4, %v1804_v50 }
 0x372 PF: > { %s23_s11 = sadd.s32 1, %s2456_s11   ;;  %s3535_s29 = smov %s2436_s30 }
 0x373   : > { %p20_p6 = scmp.ge.s32.totalorder %s23_s11, 6   ;;  %s3536_s30 = smov %s2557_s18 }
 0x374   : > { %s3537_s8 = smov %s2448_s9  ;;  %s3538_s0 = smov %s2452_s10 }
 0x375   : > { %s3539_s9 = smov %s3542_s12  ;;  %s3540_s10 = smov %s3546_s13 }
 0x376   :  { %22 = sbr.rel (!%p20_p6) target bundleno = 19 (0x13), region = 139 }

</bundles_post_ra>
